<compile_context>
chip_gen: v6e
topology: v6e:2x2x1
jax: 0.10.0
libtpu: 0.0.40
codegen_flags: <defaults>
</compile_context>

<pallas_src>
import jax
import jax.numpy as jnp
from jax.experimental import pallas as pl
from jax.experimental.pallas import tpu as pltpu


def _round_up(x: int, m: int) -> int:
    return ((x + m - 1) // m) * m


# ---------------------------------------------------------------------------
# Kernels
# ---------------------------------------------------------------------------
def _linear_kernel_acc(x_ref, w_ref, b_ref, o_ref, acc_ref):
    """Multi-K-block path. x:[tm,tk], w:[tk,tn], b:[1,tn], acc: f32 [tm,tn]."""
    k = pl.program_id(2)

    @pl.when(k == 0)
    def _init():
        # Fold the bias into the accumulator init: saves a tm x tn zero-store
        # plus a separate broadcast+add in the epilogue.
        acc_ref[...] = jnp.broadcast_to(
            b_ref[...].astype(jnp.float32), acc_ref.shape
        )

    acc_ref[...] += jnp.dot(
        x_ref[...], w_ref[...], preferred_element_type=jnp.float32
    )

    @pl.when(k == pl.num_programs(2) - 1)
    def _finalize():
        o_ref[...] = acc_ref[...].astype(o_ref.dtype)


def _linear_kernel_single(x_ref, w_ref, b_ref, o_ref):
    """Single-K-block path: no scratch, no init/finalize branches."""
    acc = jnp.dot(x_ref[...], w_ref[...], preferred_element_type=jnp.float32)
    o_ref[...] = (acc + b_ref[...].astype(jnp.float32)).astype(o_ref.dtype)


# ---------------------------------------------------------------------------
# Wrapper
# ---------------------------------------------------------------------------
def _choose_tiles(B, OUT, K, tm, tn, tk):
    """Clamp tiles to the problem, keep them legal, keep >=2 parallel blocks."""
    tm = B if B <= tm else tm          # full-dim block is always legal
    tn = OUT if OUT <= tn else tn
    # tk must be a 128-multiple divisor of K (K is already a 128 multiple) so
    # no out-of-bounds garbage can enter the K accumulation.
    tk = min(tk, K)
    while K % tk != 0:
        tk -= 128
    # v7x has 2 TensorCores: make sure the (i, j) grid has >= 2 parallel blocks.
    while pl.cdiv(B, tm) * pl.cdiv(OUT, tn) < 2:
        if tn >= 256 and tn % 256 == 0:      # stays a multiple of 128
            tn //= 2
        elif tm >= 16 and tm % 16 == 0:      # stays a multiple of 8
            tm //= 2
        else:
            break
    return tm, tn, tk


def pallas_linear(x, w_t, b, *, tm=256, tn=256, tk=1024):
    """y = x @ w_t + b with w_t pre-transposed to [K, OUT] (K zero-padded).

    x: [B, IN] (IN <= K), w_t: [K, OUT] (rows >= IN are zeros), b: [OUT].
    The caller (InnerLinear) caches w_t once; nothing weight-sized is touched
    per call outside the kernel's own DMA stream.
    """
    B, IN = x.shape
    K, OUT = w_t.shape
    assert K >= IN and b.shape == (OUT,)

    # Tiny layers: pallas_call fixed overhead dominates; XLA's fused dot wins.
    if B * OUT * IN <= 64 * 128 * 128:
        w_use = w_t if K == IN else w_t[:IN]
        return (x @ w_use).astype(jnp.float32) + b

    if x.dtype != w_t.dtype:
        x = x.astype(w_t.dtype)

    # Align the contraction dim to 128 lanes only (not to tk).
    K_al = _round_up(K, 128)
    if K_al != K:  # defensive: cached weights are normally already aligned
        w_t = jnp.pad(w_t, ((0, K_al - K), (0, 0)))
    if x.shape[1] != K_al:
        x = jnp.pad(x, ((0, 0), (0, K_al - x.shape[1])))  # zeros -> exact sum
    K = K_al

    tm, tn, tk = _choose_tiles(B, OUT, K, tm, tn, tk)
    grid_m, grid_n, grid_k = pl.cdiv(B, tm), pl.cdiv(OUT, tn), K // tk

    b2 = b.reshape(1, OUT)
    out_dtype = b.dtype
    in_itemsize = jnp.dtype(x.dtype).itemsize
    out_itemsize = jnp.dtype(out_dtype).itemsize
    # Account for re-streaming: x is read once per N block, W.T once per M block.
    cost = pl.CostEstimate(
        flops=2 * B * K * OUT,
        transcendentals=0,
        bytes_accessed=(
            grid_n * B * K * in_itemsize
            + grid_m * K * OUT * in_itemsize
            + B * OUT * out_itemsize
            + OUT * 4
        ),
    )
    common = dict(
        out_shape=jax.ShapeDtypeStruct((B, OUT), out_dtype),
        cost_estimate=cost,
    )

    if grid_k == 1:
        return pl.pallas_call(
            _linear_kernel_single,
            grid=(grid_m, grid_n),
            in_specs=[
                pl.BlockSpec((tm, tk), lambda i, j: (i, 0)),
                pl.BlockSpec((tk, tn), lambda i, j: (0, j)),
                pl.BlockSpec((1, tn), lambda i, j: (0, j)),
            ],
            out_specs=pl.BlockSpec((tm, tn), lambda i, j: (i, j)),
            compiler_params=pltpu.CompilerParams(
                dimension_semantics=("parallel", "parallel"),
            ),
            **common,
        )(x, w_t, b2)

    # Multi-K accumulation: K innermost ("arbitrary"), f32 VMEM accumulator.
    # NOTE: if profiling on v5e shows exposed DMA on the W.T stream, bump
    # in_specs[1] to pipeline_mode=pl.Buffered(3).
    return pl.pallas_call(
        _linear_kernel_acc,
        grid=(grid_m, grid_n, grid_k),
        in_specs=[
            pl.BlockSpec((tm, tk), lambda i, j, k: (i, k)),   # x tile
            pl.BlockSpec((tk, tn), lambda i, j, k: (k, j)),   # W.T tile
            pl.BlockSpec((1, tn), lambda i, j, k: (0, j)),    # bias tile
        ],
        out_specs=pl.BlockSpec((tm, tn), lambda i, j, k: (i, j)),
        scratch_shapes=[pltpu.VMEM((tm, tn), jnp.float32)],
        compiler_params=pltpu.CompilerParams(
            dimension_semantics=("parallel", "parallel", "arbitrary"),
        ),
        **common,
    )(x, w_t, b2)


class InnerLinear:
    """Deterministic stand-in for the wrapped torch module (nn.Linear)."""

    def __init__(self, in_features, out_features, key,
                 compute_dtype=jnp.float32):
        kw, kb = jax.random.split(key)
        bound = 1.0 / (in_features ** 0.5)
        self.weight = jax.random.uniform(
            kw, (out_features, in_features), jnp.float32, -bound, bound)
        self.bias = jax.random.uniform(
            kb, (out_features,), jnp.float32, -bound, bound)
        self.compute_dtype = compute_dtype
        # One-time (hoisted) layout work, since weights are static:
        #   transpose to [IN, OUT] (MXU-friendly RHS, lane-major output),
        #   zero-pad the contraction dim to a 128 multiple,
        #   cast to the MXU feed dtype (bf16 on v6e/v7x for peak throughput).
        k_pad = _round_up(in_features, 128)
        w_t = self.weight.T
        if k_pad != in_features:
            w_t = jnp.pad(w_t, ((0, k_pad - in_features), (0, 0)))
        self.w_t = w_t.astype(compute_dtype)

    def __call__(self, x):
        return pallas_linear(x.astype(self.compute_dtype), self.w_t, self.bias)


class Flatten:
    """JAX port of torch2trt's Flatten wrapper (forward semantics only)."""

    def __init__(self, module, input_flattener=None, output_flattener=None):
        self.module = module
        self.input_flattener = input_flattener
        self.output_flattener = output_flattener

    def __call__(self, *args):
        if self.input_flattener is not None:
            args = self.input_flattener.unflatten(*args)
        output = self.module(*args)
        if self.output_flattener is not None:
            output = self.output_flattener.flatten(output)
        return output


if __name__ == "__main__":
    key = jax.random.PRNGKey(0)
    k_in, k_mod, k_tiny = jax.random.split(key, 3)

    # ---- main path: multi-K-block accumulator kernel, f32 feed ------------
    B, IN, OUT = 32, 2048, 384
    x = jax.random.normal(k_in, (B, IN), dtype=jnp.float32)
    inner = InnerLinear(IN, OUT, k_mod)                 # f32 MXU feed
    model = Flatten(inner)                              # identity flatteners
    y = jax.block_until_ready(model(x))
    y_ref = x @ inner.weight.T + inner.bias
    assert y.shape == (B, OUT)
    assert jnp.allclose(y, y_ref, atol=2e-2, rtol=2e-2), (
        float(jnp.max(jnp.abs(y - y_ref))))

    # ---- bf16 MXU-feed path (v6e / v7x lever), f32 accumulate -------------
    inner_bf16 = InnerLinear(IN, OUT, k_mod, compute_dtype=jnp.bfloat16)
    y_b = jax.block_until_ready(Flatten(inner_bf16)(x))
    x_b = x.astype(jnp.bfloat16).astype(jnp.float32)
    w_b = inner_bf16.weight.T.astype(jnp.bfloat16).astype(jnp.float32)
    y_b_ref = x_b @ w_b + inner_bf16.bias
    assert jnp.allclose(y_b, y_b_ref, atol=3e-2, rtol=3e-2), (
        float(jnp.max(jnp.abs(y_b - y_b_ref))))

    # ---- tiny-layer fallback path ------------------------------------------
    Bs, INs, OUTs = 8, 48, 32
    xs = jax.random.normal(k_tiny, (Bs, INs), dtype=jnp.float32)
    inner_s = InnerLinear(INs, OUTs, k_mod)
    ys = jax.block_until_ready(Flatten(inner_s)(xs))
    ys_ref = xs @ inner_s.weight.T + inner_s.bias
    assert ys.shape == (Bs, OUTs)
    assert jnp.allclose(ys, ys_ref, atol=1e-4, rtol=1e-4)

    print("KERNEL_OK")
</pallas_src>

<mosaic_0001>
module attributes {stable_mosaic.version = 11 : i64} {
  func.func @_linear_kernel_acc(%arg0: i32, %arg1: i32, %arg2: i32, %arg3: memref<32x1024xf32, #tpu.memory_space<vmem>>, %arg4: memref<1024x256xf32, #tpu.memory_space<vmem>>, %arg5: memref<1x256xf32, #tpu.memory_space<vmem>>, %arg6: memref<32x256xf32, #tpu.memory_space<vmem>>, %arg7: memref<32x256xf32, #tpu.memory_space<vmem>>) attributes {dimension_semantics = [#tpu.dimension_semantics<parallel>, #tpu.dimension_semantics<parallel>, #tpu.dimension_semantics<arbitrary>], iteration_bounds = array<i64: 1, 2, 2>, scalar_prefetch = 0 : i64, scratch_operands = 1 : i64, tpu.core_type = #tpu.core_type<tc>, window_params = [{transform_indices = @transform_0, window_bounds = array<i64: 32, 1024>}, {transform_indices = @transform_1, window_bounds = array<i64: 1024, 256>}, {transform_indices = @transform_2, window_bounds = array<i64: 1, 256>}, {transform_indices = @transform_3, window_bounds = array<i64: 32, 256>}]} {
    %c0_i32 = arith.constant 0 : i32
    %0 = arith.cmpi eq, %arg2, %c0_i32 : i32
    %1 = arith.extui %0 : i1 to i32
    %c0_i32_0 = arith.constant 0 : i32
    %2 = arith.cmpi ne, %1, %c0_i32_0 : i32
    scf.if %2 {
      %c0_9 = arith.constant 0 : index
      %c0_10 = arith.constant 0 : index
      %12 = vector.load %arg5[%c0_9, %c0_10] : memref<1x256xf32, #tpu.memory_space<vmem>>, vector<1x256xf32>
      %13 = vector.shape_cast %12 : vector<1x256xf32> to vector<1x256xf32>
      %14 = vector.broadcast %13 : vector<1x256xf32> to vector<32x256xf32>
      %c0_11 = arith.constant 0 : index
      %c0_12 = arith.constant 0 : index
      %15 = vector.load %arg7[%c0_11, %c0_12] : memref<32x256xf32, #tpu.memory_space<vmem>>, vector<32x256xf32>
      tpu.vector_store %arg7[%c0_11, %c0_12], %14 {strides = array<i32>} : memref<32x256xf32, #tpu.memory_space<vmem>>, vector<32x256xf32>,
    } else {
    }
    %c0 = arith.constant 0 : index
    %c0_1 = arith.constant 0 : index
    %3 = vector.load %arg7[%c0, %c0_1] : memref<32x256xf32, #tpu.memory_space<vmem>>, vector<32x256xf32>
    %c0_2 = arith.constant 0 : index
    %c0_3 = arith.constant 0 : index
    %4 = vector.load %arg3[%c0_2, %c0_3] : memref<32x1024xf32, #tpu.memory_space<vmem>>, vector<32x1024xf32>
    %c0_4 = arith.constant 0 : index
    %c0_5 = arith.constant 0 : index
    %5 = vector.load %arg4[%c0_4, %c0_5] : memref<1024x256xf32, #tpu.memory_space<vmem>>, vector<1024x256xf32>
    %cst = arith.constant dense<0.000000e+00> : vector<32x256xf32>
    %6 = tpu.matmul %4, %5, %cst {dimension_numbers = #tpu.dot_dimension_numbers<[1], [0], [0], [1], [0, 0, 1, 1], [], []>} : vector<32x1024xf32>, vector<1024x256xf32>, vector<32x256xf32> -> vector<32x256xf32>
    %7 = arith.addf %3, %6 : vector<32x256xf32>
    %c0_6 = arith.constant 0 : index
    %c0_7 = arith.constant 0 : index
    %8 = vector.load %arg7[%c0_6, %c0_7] : memref<32x256xf32, #tpu.memory_space<vmem>>, vector<32x256xf32>
    tpu.vector_store %arg7[%c0_6, %c0_7], %7 {strides = array<i32>} : memref<32x256xf32, #tpu.memory_space<vmem>>, vector<32x256xf32>,
    %c1_i32 = arith.constant 1 : i32
    %9 = arith.cmpi eq, %arg2, %c1_i32 : i32
    %10 = arith.extui %9 : i1 to i32
    %c0_i32_8 = arith.constant 0 : i32
    %11 = arith.cmpi ne, %10, %c0_i32_8 : i32
    scf.if %11 {
      %c0_9 = arith.constant 0 : index
      %c0_10 = arith.constant 0 : index
      %12 = vector.load %arg7[%c0_9, %c0_10] : memref<32x256xf32, #tpu.memory_space<vmem>>, vector<32x256xf32>
      %c0_11 = arith.constant 0 : index
      %c0_12 = arith.constant 0 : index
      %13 = vector.load %arg6[%c0_11, %c0_12] : memref<32x256xf32, #tpu.memory_space<vmem>>, vector<32x256xf32>
      tpu.vector_store %arg6[%c0_11, %c0_12], %12 {strides = array<i32>} : memref<32x256xf32, #tpu.memory_space<vmem>>, vector<32x256xf32>,
    } else {
    }
    return
  }
  func.func @transform_0(%arg0: i32, %arg1: i32, %arg2: i32) -> (i32, i32) {
    %c0_i32 = arith.constant 0 : i32
    return %arg0, %arg2 : i32, i32
  }
  func.func @transform_1(%arg0: i32, %arg1: i32, %arg2: i32) -> (i32, i32) {
    %c0_i32 = arith.constant 0 : i32
    return %arg2, %arg1 : i32, i32
  }
  func.func @transform_2(%arg0: i32, %arg1: i32, %arg2: i32) -> (i32, i32) {
    %c0_i32 = arith.constant 0 : i32
    %c0_i32_0 = arith.constant 0 : i32
    return %c0_i32, %arg1 : i32, i32
  }
  func.func @transform_3(%arg0: i32, %arg1: i32, %arg2: i32) -> (i32, i32) {
    %c0_i32 = arith.constant 0 : i32
    return %arg0, %arg1 : i32, i32
  }
}

</mosaic_0001>

<bundles_post_ra>
// kernel: tpu_custom_call.1
= control target key start
LH: loop header
LB: loop body
LE: loop exit
PB: predicated region body
PF: predicated region fallthrough
CT: control target
= control target key end

     0   :  { %s2289_s0 = inlined_call_operand.hbm [shape: f32[32,2048], index: 0, kind: input, shape index: {}]   ;;  %s2290_s1 = inlined_call_operand.hbm [shape: f32[2048,384], index: 1, kind: input, shape index: {}]   ;;  %s2291_s2 = inlined_call_operand.hbm [shape: f32[1,384], index: 2, kind: input, shape index: {}]   ;;  %s2292_s3 = inlined_call_operand.hbm [shape: f32[32,384], index: 3, kind: output, shape index: {}]  }
   0x1   :  { %2303 = sst [smem:[#allocation26_spill]] %s2289_s0 }
   0x2   :  { %2304 = sst [smem:[#allocation27_spill]] %s2292_s3 }
   0x3   :  { %8 = vsyncpa [#allocation4], 0 }
   0x4   :  { %10 = vsyncpa [#allocation4 + $0x1], 0 }
   0x5   :  { %11 = vsyncpa [#allocation7], 0 }
   0x6   :  { %13 = vsyncpa [#allocation7 + $0x1], 0 }
   0x7   :  { %14 = vsyncpa [#allocation5], 0 }
   0x8   :  { %16 = vsyncpa [#allocation5 + $0x1], 0  ;;  %s1640_s12 = smov 0   ;;  %s1642_s13 = smov 0  }
   0x9   :  { %s1644_s14 = smov 0   ;;  %s1646_s15 = smov 0  }
   0xa   :  { %s1648_s16 = smov 0   ;;  %s1650_s17 = smov 0  }
   0xb   :  { %s1652_s18 = smov 0   ;;  %s1654_s19 = smov 0  }
   0xc   :  { %s1656_s20 = smov 0   ;;  %s1658_s21 = smov 0  }
   0xd   :  { %s1660_s22 = smov 0   ;;  %s1662_s23 = smov 0  }
   0xe   :  { %s1664_s24 = smov 0   ;;  %s1666_s25 = smov 0  }
   0xf LB: > { %2305 = sst [smem:[#allocation14_spill]] %s1555_s12  ;;  %s1709_s26 = sadd.s32 4294967295, %s1607_s25   ;;  %s1607_s25 = sphi %s1666_s25, %s22_s25   ;;  %s1603_s24 = sphi %s1664_s24, %s2355_s24   ;;  %s1599_s23 = sphi %s1662_s23, %s2354_s23   ;;  %s1595_s22 = sphi %s1660_s22, %s2353_s22   ;;  %s1591_s21 = sphi %s1658_s21, %s2352_s21   ;;  %s1587_s20 = sphi %s1656_s20, %s2341_s20   ;;  %s1583_s19 = sphi %s1654_s19, %s2351_s19   ;;  %s1579_s18 = sphi %s1652_s18, %s2350_s18   ;;  %s1575_s17 = sphi %s1650_s17, %s2349_s17   ;;  %s1571_s16 = sphi %s1648_s16, %s2348_s16   ;;  %s1567_s15 = sphi %s1646_s15, %s2347_s15   ;;  %s1563_s14 = sphi %s1644_s14, %s2346_s14   ;;  %s1559_s13 = sphi %s1642_s13, %s2345_s13   ;;  %s1555_s12 = sphi %s1640_s12, %s2344_s12  }
  0x10   : > { %2306 = sst [smem:[#allocation15_spill]] %s1587_s20  ;;  %s34_s28 = sadd.s32 1, %s1599_s23 }
  0x11   : > { %2307 = sst [smem:[#allocation16_spill]] %s1591_s21  ;;  %s37_s29 = sadd.s32 1, %s1603_s24 }
  0x12   : > { %2308 = sst [smem:[#allocation17_spill]] %s1595_s22  ;;  %p35_p0 = scmp.ge.s32.totalorder %s34_s28, 2 }
  0x13   : > { %s50_s30 = sadd.s32 1, %s1587_s20  ;;  %p57_p1 = scmp.ne.s32.totalorder %s1587_s20, %s1583_s19 }
  0x14   : > { %p58_p2 = scmp.eq.s32.totalorder %s1607_s25, 0  ;;  %s2357_s28 = smov (%p35_p0, %s34_s28), 0 }
  0x15   : > { %2309 = sst [smem:[#allocation18_spill]] %s2357_s28  ;;  %s2359_s29 = smov (!%p35_p0, %s37_s29), %s1603_s24 }
  0x16   : > { %s46_s4 = ssub.s32 %s1599_s23, %s2357_s28  ;;  %p1725_p3 = por %p58_p2, %p57_p1 }
  0x17   : > { %p39_p4 = scmp.ge.s32.totalorder %s2359_s29, 2  ;;  %p48_p5 = scmp.eq.s32.totalorder %s46_s4, 0 }
  0x18   : > { %p63_p6 = scmp.ne.s32.totalorder %s1583_s19, %s1579_s18  ;;  %p64_p7 = scmp.eq.s32.totalorder %s1709_s26, 0 }
  0x19   : > { %s2361_s29 = smov (%p39_p4, %s2359_s29), 0  ;;  %s78_s10 = sadd.s32 1, %s1575_s17 }
  0x1a   : > { %2311 = sst [smem:[#allocation19_spill]] %s2361_s29  ;;  %p1738_p8 = por %p64_p7, %p63_p6 }
  0x1b   : > { %s1734_s6 = scalar_select %p48_p5, %s1587_s20, %s50_s30  }
  0x1c   : > { %s74_s8 = ssub.s32 %s1603_s24, %s2361_s29  ;;  %p85_p10 = scmp.ne.s32.totalorder %s1575_s17, %s1571_s16 }
  0x1d   : > { %2312 = sst [smem:[#allocation20_spill]] %s1734_s6  ;;  %s75_s9 = sor.u32 %s74_s8, %s46_s4 }
  0x1e   : > { %p76_p9 = scmp.eq.s32.totalorder %s75_s9, 0  ;;  %p91_p11 = scmp.ne.s32.totalorder %s1571_s16, %s1567_s15 }
  0x1f   : > { %p102_p12 = scmp.eq.s32.totalorder %s74_s8, 0  ;;  %p1754_p13 = por %p85_p10, %p58_p2 }
  0x20   : > { %s1750_s11 = scalar_select %p76_p9, %s1575_s17, %s78_s10  }
  0x21   : > { %p1760_p0 = por %p91_p11, %p64_p7  ;;  %s104_s27 = sadd.s32 1, %s1563_s14 }
  0x22   : > { %2314 = sst [smem:[#allocation21_spill]] %s1750_s11  ;;  %p111_p1 = scmp.ne.s32.totalorder %s1563_s14, %s1559_s13 }
  0x23   : > { %s1768_s4 = scalar_select %p102_p12, %s1563_s14, %s104_s27  }
  0x24   : > { %p1772_p4 = por %p111_p1, %p58_p2  ;;  %p117_p5 = scmp.ne.s32.totalorder %s1559_s13, %s1555_s12 }
  0x25   : > { %2317 = sst [smem:[#allocation22_spill]] %s1768_s4  ;;  %p143_p6 = scmp.eq.s32.totalorder %s1709_s26, 3 }
  0x26   : > { %s2319_s8 = sadd.s32 4294967294, %s1607_s25   ;;  %p1783_p10 = por %p117_p5, %p64_p7 }
  0x27   : > { %p149_p9 = scmp.eq.s32.totalorder %s2319_s8, 3  ;;  %p1787_p11 = por %p143_p6, %p111_p1 }
  0x28   : > { %s2320_s9 = scalar_select %p1783_p10, 1, 0 }
  0x29   : > { %s2322_s10 = scalar_select %p1787_p11, 1, 0 }
  0x2a   : > { %2321 = sst [smem:[#allocation23_spill]] %s2320_s9  ;;  %p1791_p12 = por %p149_p9, %p117_p5 }
  0x2b   : > { %2323 = sst [smem:[#allocation24_spill]] %s2322_s10  ;;  %p1204_p2 = scmp.ge.s32.totalorder %s1607_s25, 4 }
  0x2c   : > { %s2324_s27 = scalar_select %p1791_p12, 1, 0 }
  0x2d   : > { %165 = sbr.rel (%p1204_p2) target bundleno = 118 (0x76), region = 16  ;;  %s169_s8 = sand.u32 (!%p1204_p2), 1, %s1587_s20  }
  0x2e   : > { %2325 = sst [smem:[#allocation25_spill]] %s2324_s27  ;;  %s1240_s29 = sshll.u32 (!%p1204_p2), %s1599_s23, 10 }
  0x2f   : > { %s1205_s28 = sshll.u32 (!%p1204_p2), %s169_s8, 8  ;;  %s2326_s0 = sld [smem:[#allocation26_spill]] (!%p1204_p2) }
  0x30   : > { %s173_s12 = scalar_lea.vmem (!%p1204_p2), [#allocation3], %s1205_s28  ;;  %s170_s22 = scalar_lea.sflag (!%p1204_p2), [#allocation4], %s169_s8 }
  0x31   : > { %s183_s3 = sshll.u32 (!%p1204_p2), %s173_s12, 4  ;;  %s1609_s27 = smov (!%p1204_p2), [#allocation3]   ;;  %s184_s3 = int_to_ptr.vmem [resolvable:$true] %s183_s3 }
  0x32   : > { %s1389_s10 = scalar_lea.vmem %s184_s3, 4096  ;;  %s1393_s21 = sshll.u32 %s1609_s27, 4  ;;  %s1394_s21 = int_to_ptr.vmem [resolvable:$false] %s1393_s21 }
  0x33   : > { %p1390_p7 = scmp.ne.s32.totalorder %s184_s3, %s1389_s10  ;;  %s1395_s9 = scalar_lea.vmem %s1394_s21, 8192 }
  0x34   : > { %p1396_p6 = scmp.lt.s32.totalorder %s184_s3, %s1394_s21  ;;  %p1397_p9 = scmp.lt.s32.totalorder %s1395_s9, %s1389_s10 }
  0x35   : > { %s182_s4 = scalar_lea.hbm %s2326_s0, %s1240_s29  ;;  %p1391_p1 = pnand %p1390_p7, %p1725_p3 }
  0x36   : > { %p1398_p2 = por %p1397_p9, %p1396_p6 }
  0x37   : > { %p1392_p5 = pneg %p1391_p1 }
  0x39   : > { %p1399_p12 = pnand %p1398_p2, %p1392_p5 }
  0x3b   : > { %1402 = shalt.err (!%p1399_p12)
}
  0x3c   : > { %s1610_s6 = smov 2048   ;;  %s1611_s28 = smov 1024  }
  0x3d   : > { %s1612_s12 = smov 64   ;;  %192 = sbr.rel (!%p1754_p13) target bundleno = 87 (0x57), region = 24 }
  0x3e   : > { %1248 = dma.hbm_to_vmem [thread:$0]  (%p1725_p3), %s182_s4, 4096, %s184_s3, %s170_s22, %s1610_s6, %s1611_s28, %s1612_s12  }
  0x3f   : > { %s193_s29 = sand.u32 (%p1754_p13), 1, %s1607_s25   ;;  %s195_s11 = sand.u32 (%p1754_p13), 1, %s1575_s17  }
  0x40   : > { %s1208_s27 = sshll.u32 (%p1754_p13), %s195_s11, 11  ;;  %s1210_s21 = sshll.u32 (%p1754_p13), %s1603_s24, 1 }
  0x41   : > { %s200_s9 = ssub.s32 (%p1754_p13), 3, %s1210_s21  ;;  %s1816_s3 = scalar_lea.sflag (%p1754_p13), [#allocation7], %s193_s29 }
  0x42   : > { %p201_p7 = scmp.lt.s32.totalorder %s200_s9, 2  ;;  %s197_s22 = scalar_lea.vmem [#allocation6], %s1208_s27 }
  0x44   : > { %s2363_s9 = smov (!%p201_p7, %s200_s9), 2 }
  0x45   : > { %s1813_s10 = sshll.u32 %s2363_s9, 14 }
  0x46   : > { %s205_s5 = ssub.s32 32768, %s1813_s10 }
  0x47   : > { %206 = vsyncadd %s1816_s3, %s205_s5  ;;  %p1212_p3 = scmp.ne.s32.totalorder %s1813_s10, 0  ;;  %s1247_s18 = smul.u32 384, %s1599_s23 }
  0x48   : > { %s1215_s4 = sshll.u32 %s2363_s9, 3  ;;  %s214_s8 = sshll.u32 %s197_s22, 4  ;;  %s215_s8 = int_to_ptr.vmem [resolvable:$true] %s214_s8 }
  0x49   : > { %s209_s6 = sadd.s32 %s1247_s18, %s1210_s21  ;;  %s1415_s0 = scalar_lea.vmem %s215_s8, %s1813_s10 }
  0x4a   : > { %s1214_s28 = sshll.u32 %s209_s6, 7  ;;  %p1416_p13 = scmp.ne.s32.totalorder %s215_s8, %s1415_s0 }
  0x4b   : > { %s211_s29 = scalar_lea.hbm %s2290_s1, %s1214_s28  ;;  %s1613_s27 = smov [#allocation6]  }
  0x4c   : > { %p1417_p12 = pnand %p1416_p13, %p1212_p3  ;;  %s1419_s5 = sshll.u32 %s1613_s27, 4  ;;  %s1420_s5 = int_to_ptr.vmem [resolvable:$false] %s1419_s5 }
  0x4d   : > { %s1421_s20 = scalar_lea.vmem %s1420_s5, 65536  ;;  %p1422_p5 = scmp.lt.s32.totalorder %s215_s8, %s1420_s5 }
  0x4e   : > { %p1418_p1 = pneg %p1417_p12  ;;  %p1423_p6 = scmp.lt.s32.totalorder %s1421_s20, %s1415_s0 }
  0x50   : > { %p1424_p9 = por %p1423_p6, %p1422_p5 }
  0x52   : > { %p1425_p2 = pnand %p1424_p9, %p1418_p1 }
  0x54   : > { %1428 = shalt.err (!%p1425_p2)
}
  0x55   : > { %s1614_s21 = smov 384   ;;  %s1615_s9 = smov 256  }
  0x56   : > { %220 = dma.hbm_to_vmem [thread:$0]  (%p1212_p3), %s211_s29, %s1813_s10, %s215_s8, %s1816_s3, %s1614_s21, %s1615_s9, %s1215_s4  }
  0x57 PF: > { %223 = sbr.rel (!%p1772_p4) target bundleno = 118 (0x76), region = 28  ;;  %s224_s22 = sand.u32 (%p1772_p4), 1, %s1607_s25  }
  0x58   : > { %s226_s18 = sand.u32 (%p1772_p4), 1, %s1563_s14   ;;  %s1219_s20 = sshll.u32 (%p1772_p4), %s1603_s24, 1 }
  0x59   : > { %s1218_s0 = sshll.u32 (%p1772_p4), %s226_s18, 1  ;;  %s230_s6 = ssub.s32 (%p1772_p4), 3, %s1219_s20 }
  0x5a   : > { %p231_p7 = scmp.lt.s32.totalorder (%p1772_p4), %s230_s6, 2  ;;  %s1840_s11 = scalar_lea.sflag (%p1772_p4), [#allocation7], %s224_s22 }
  0x5b   : > { %s228_s10 = scalar_lea.vmem (%p1772_p4), [#allocation8], %s1218_s0 }
  0x5c   : > { %s2365_s6 = smov (!%p231_p7, %s230_s6), 2 }
  0x5d   : > { %s1837_s28 = sshll.u32 %s2365_s6, 4 }
  0x5e   : > { %s235_s12 = ssub.s32 32, %s1837_s28 }
  0x5f   : > { %236 = vsyncadd %s1840_s11, %s235_s12  ;;  %p1221_p4 = scmp.ne.s32.totalorder %s1837_s28, 0  ;;  %s1243_s15 = sshll.u32 %s1603_s24, 5 }
  0x60   : > { %s239_s8 = scalar_lea.hbm %s2291_s2, %s1243_s15  ;;  %s241_s29 = sshll.u32 %s228_s10, 4  ;;  %s242_s29 = int_to_ptr.vmem [resolvable:$true] %s241_s29 }
  0x61   : > { %s1429_s27 = scalar_lea.hbm %s239_s8, %s1837_s28  ;;  %s1433_s9 = scalar_lea.hbm %s2291_s2, 48 }
  0x62   : > { %p1430_p3 = scmp.ne.s32.totalorder %s239_s8, %s1429_s27  ;;  %p1435_p1 = scmp.lt.s32.totalorder %s1433_s9, %s1429_s27 }
  0x64   : > { %p1431_p13 = pnand %p1430_p3, %p1221_p4 }
  0x66   : > { %p1432_p12 = pneg %p1431_p13 }
  0x68   : > { %p1437_p5 = pnand %p1435_p1, %p1432_p12 }
  0x6a   : > { %1440 = shalt.err (!%p1437_p5)
}
  0x6b   : > { %s1441_s22 = scalar_lea.vmem %s242_s29, %s1837_s28  ;;  %s1616_s18 = smov [#allocation8]  }
  0x6c   : > { %p1442_p6 = scmp.ne.s32.totalorder %s242_s29, %s1441_s22  ;;  %s1445_s0 = sshll.u32 %s1616_s18, 4  ;;  %s1446_s0 = int_to_ptr.vmem [resolvable:$false] %s1445_s0 }
  0x6d   : > { %s1447_s20 = scalar_lea.vmem %s1446_s0, 64  ;;  %p1448_p7 = scmp.lt.s32.totalorder %s242_s29, %s1446_s0 }
  0x6e   : > { %p1443_p9 = pnand %p1442_p6, %p1221_p4  ;;  %p1449_p3 = scmp.lt.s32.totalorder %s1447_s20, %s1441_s22 }
  0x70   : > { %p1444_p2 = pneg %p1443_p9  ;;  %p1450_p13 = por %p1449_p3, %p1448_p7 }
  0x72   : > { %p1451_p11 = pnand %p1450_p13, %p1444_p2 }
  0x74   : > { %1454 = shalt.err (!%p1451_p11)
}
  0x75   : > { %244 = dma.hbm_to_vmem [thread:$0]  (%p1221_p4), %s239_s8, %s1837_s28, %s242_s29, %s1840_s11  }
  0x76 PF: > { %p1223_p12 = scmp.ge.s32.totalorder %s1607_s25, 1  ;;  %p246_p1 = scmp.lt.s32.totalorder %s1607_s25, 5 }
  0x78   : > { %p247_p5 = pnand %p1223_p12, %p246_p1 }
  0x79   : > { %s252_s6 = sand.u32 (!%p247_p5), 1, %s1583_s19  }
  0x7a   : > { %250 = sbr.rel (%p247_p5) target bundleno = 566 (0x236), region = 32  ;;  %s1224_s12 = sshll.u32 (!%p247_p5), %s252_s6, 8 }
  0x7b   : > { %s253_s10 = scalar_lea.sflag (!%p247_p5), [#allocation4], %s252_s6  ;;  %s1864_s15 = scalar_lea.vmem (!%p247_p5), [#allocation3], %s1224_s12 }
  0x7f   : > { %1538 = dma.done.wait (%p1738_p8), %s253_s10, 4096  }
  0x80   : > { %1540 = vsyncadd (%p1738_p8), %s253_s10, 4294963200  ;;  %s261_s28 = sand.u32 1, %s1709_s26   ;;  %s263_s11 = sand.u32 1, %s1571_s16  }
  0x81   : > { %s1225_s3 = sshll.u32 %s263_s11, 11  ;;  %s262_s4 = scalar_lea.sflag [#allocation7], %s261_s28 }
  0x82   : > { %s1872_s8 = scalar_lea.vmem [#allocation6], %s1225_s3 }
  0x83   : > { %1542 = dma.done.wait (%p1760_p0), %s262_s4, 32768  }
  0x84   : > { %1544 = vsyncadd (%p1760_p0), %s262_s4, 4294934528  ;;  %s1879_s27 = sand.u32 1, %s1559_s13  }
  0x85   : > { %s1226_s7 = sshll.u32 %s1879_s27, 1 }
  0x86   : > { %s274_s5 = scalar_lea.vmem [#allocation8], %s1226_s7 }
  0x87   : > { %1546 = dma.done.wait (%p1783_p10), %s262_s4, 32  }
  0x88   : > { %1548 = vsyncadd (%p1783_p10), %s262_s4, 4294967264  ;;  %s1227_s26 = sshll.u32 %s1879_s27, 6  ;;  %s2328_s9 = sld [smem:[#allocation16_spill]] }
  0x89   : > { %s1887_s21 = scalar_lea.vmem [#allocation9], %s1227_s26 }
  0x8e   : > { %p1228_p8 = scmp.ne.s32.totalorder %s2328_s9, 0 }
  0x90   : > { %329 = sbr.rel (%p1228_p8) target bundleno = 161 (0xa1), region = 48 }
  0x95   : > { %v332_v0 = vlaneseq  ;;  %v330_v2 = vld [vmem:[%s274_s5] sm:$0x3] }
  0x97   : > { %v333_v1 = vshrl.u32 %v332_v0, 7 }
  0x99   : > { %v334_v3 = vsub.s32 0, %v333_v1  ;;  %v338_v4 = vsub.s32 1, %v333_v1 }
  0x9b   : > { %v335_v5 = vrot.slane %v330_v2, %v334_v3  ;;  %v339_v6 = vrot.slane %v330_v2, %v338_v4 }
  0x9d   : > { %342 = vst [vmem:[#allocation2 + $0x30] sm:$0xff] %v335_v5  ;;  %344 = vst [vmem:[#allocation2 + $0x18] sm:$0xff] %v335_v5 }
  0x9e   : > { %346 = vst [vmem:[#allocation2 + $0x8] sm:$0xff] %v335_v5  ;;  %348 = vst [vmem:[#allocation2 + $0x28] sm:$0xff] %v335_v5 }
  0x9f   : > { %343 = vst [vmem:[#allocation2] sm:$0xff] %v339_v6  ;;  %345 = vst [vmem:[#allocation2 + $0x10] sm:$0xff] %v339_v6 }
  0xa0   : > { %347 = vst [vmem:[#allocation2 + $0x20] sm:$0xff] %v339_v6  ;;  %349 = vst [vmem:[#allocation2 + $0x38] sm:$0xff] %v339_v6 }
  0xa1 PF: > { %v421_v7 = vld [vmem:[%s1872_s8 + $0xf8] sm:$0xff]  ;;  %v420_v9 = vld [vmem:[%s1872_s8 + $0xf0] sm:$0xff]  ;;  %v419_v11 = vld [vmem:[%s1872_s8 + $0xe8] sm:$0xff]  ;;  %s2329_s30 = sld [smem:[#allocation16_spill]] }
  0xa2   : > { %v485_v8 = vld [vmem:[%s1872_s8 + $0x2f8] sm:$0xff]  ;;  %646 = vmatprep.subr.mxu0 %v421_v7  ;;  %v484_v10 = vld [vmem:[%s1872_s8 + $0x2f0] sm:$0xff]  ;;  %v483_v12 = vld [vmem:[%s1872_s8 + $0x2e8] sm:$0xff] }
  0xa3   : > { %735 = vmatprep.subr.mxu1 %v485_v8  ;;  %647 = vmatpush1.msra.mxu0 %v420_v9  ;;  %v418_v13 = vld [vmem:[%s1872_s8 + $0xe0] sm:$0xff]  ;;  %v417_v15 = vld [vmem:[%s1872_s8 + $0xd8] sm:$0xff]  ;;  %v416_v17 = vld [vmem:[%s1872_s8 + $0xd0] sm:$0xff] }
  0xa4   : > { %736 = vmatpush1.msra.mxu1 %v484_v10  ;;  %v482_v14 = vld [vmem:[%s1872_s8 + $0x2e0] sm:$0xff]  ;;  %648 = vmatprep.subr.mxu0 %v419_v11  ;;  %v481_v16 = vld [vmem:[%s1872_s8 + $0x2d8] sm:$0xff]  ;;  %v480_v18 = vld [vmem:[%s1872_s8 + $0x2d0] sm:$0xff] }
  0xa5   : > { %737 = vmatprep.subr.mxu1 %v483_v12  ;;  %649 = vmatpush1.msra.mxu0 %v418_v13  ;;  %v415_v19 = vld [vmem:[%s1872_s8 + $0xc8] sm:$0xff]  ;;  %v414_v21 = vld [vmem:[%s1872_s8 + $0xc0] sm:$0xff]  ;;  %v413_v23 = vld [vmem:[%s1872_s8 + $0xb8] sm:$0xff] }
  0xa6   : > { %738 = vmatpush1.msra.mxu1 %v482_v14  ;;  %v479_v20 = vld [vmem:[%s1872_s8 + $0x2c8] sm:$0xff]  ;;  %650 = vmatprep.subr.mxu0 %v417_v15  ;;  %v478_v22 = vld [vmem:[%s1872_s8 + $0x2c0] sm:$0xff]  ;;  %v477_v24 = vld [vmem:[%s1872_s8 + $0x2b8] sm:$0xff] }
  0xa7   : > { %739 = vmatprep.subr.mxu1 %v481_v16  ;;  %651 = vmatpush1.msra.mxu0 %v416_v17  ;;  %v412_v25 = vld [vmem:[%s1872_s8 + $0xb0] sm:$0xff]  ;;  %v411_v27 = vld [vmem:[%s1872_s8 + $0xa8] sm:$0xff]  ;;  %v410_v29 = vld [vmem:[%s1872_s8 + $0xa0] sm:$0xff]  ;;  %p1229_p0 = scmp.ne.s32.totalorder %s2329_s30, 1 }
  0xa8   : > { %740 = vmatpush1.msra.mxu1 %v480_v18  ;;  %652 = vmatprep.subr.mxu0 %v415_v19  ;;  %v476_v26 = vld [vmem:[%s1872_s8 + $0x2b0] sm:$0xff]  ;;  %v475_v28 = vld [vmem:[%s1872_s8 + $0x2a8] sm:$0xff]  ;;  %v474_v30 = vld [vmem:[%s1872_s8 + $0x2a0] sm:$0xff] }
  0xa9   : > { %741 = vmatprep.subr.mxu1 %v479_v20  ;;  %653 = vmatpush1.msra.mxu0 %v414_v21  ;;  %v409_v31 = vld [vmem:[%s1872_s8 + $0x98] sm:$0xff]  ;;  %v408_v33 = vld [vmem:[%s1872_s8 + $0x90] sm:$0xff]  ;;  %v407_v35 = vld [vmem:[%s1872_s8 + $0x88] sm:$0xff] }
  0xaa   : > { %742 = vmatpush1.msra.mxu1 %v478_v22  ;;  %654 = vmatprep.subr.mxu0 %v413_v23  ;;  %v473_v32 = vld [vmem:[%s1872_s8 + $0x298] sm:$0xff]  ;;  %v472_v34 = vld [vmem:[%s1872_s8 + $0x290] sm:$0xff]  ;;  %v471_v36 = vld [vmem:[%s1872_s8 + $0x288] sm:$0xff] }
  0xab   : > { %743 = vmatprep.subr.mxu1 %v477_v24  ;;  %655 = vmatpush1.msra.mxu0 %v412_v25  ;;  %v406_v37 = vld [vmem:[%s1872_s8 + $0x80] sm:$0xff]  ;;  %v405_v39 = vld [vmem:[%s1872_s8 + $0x78] sm:$0xff]  ;;  %v404_v41 = vld [vmem:[%s1872_s8 + $0x70] sm:$0xff] }
  0xac   : > { %744 = vmatpush1.msra.mxu1 %v476_v26  ;;  %656 = vmatprep.subr.mxu0 %v411_v27  ;;  %v470_v38 = vld [vmem:[%s1872_s8 + $0x280] sm:$0xff]  ;;  %v469_v40 = vld [vmem:[%s1872_s8 + $0x278] sm:$0xff]  ;;  %v468_v42 = vld [vmem:[%s1872_s8 + $0x270] sm:$0xff] }
  0xad   : > { %745 = vmatprep.subr.mxu1 %v475_v28  ;;  %657 = vmatpush1.msra.mxu0 %v410_v29  ;;  %v403_v43 = vld [vmem:[%s1872_s8 + $0x68] sm:$0xff]  ;;  %v402_v45 = vld [vmem:[%s1872_s8 + $0x60] sm:$0xff]  ;;  %v401_v47 = vld [vmem:[%s1872_s8 + $0x58] sm:$0xff] }
  0xae   : > { %746 = vmatpush1.msra.mxu1 %v474_v30  ;;  %658 = vmatprep.subr.mxu0 %v409_v31  ;;  %v467_v44 = vld [vmem:[%s1872_s8 + $0x268] sm:$0xff]  ;;  %v466_v46 = vld [vmem:[%s1872_s8 + $0x260] sm:$0xff]  ;;  %v465_v48 = vld [vmem:[%s1872_s8 + $0x258] sm:$0xff] }
  0xaf   : > { %747 = vmatprep.subr.mxu1 %v473_v32  ;;  %659 = vmatpush1.msra.mxu0 %v408_v33  ;;  %v400_v49 = vld [vmem:[%s1872_s8 + $0x50] sm:$0xff]  ;;  %v399_v51 = vld [vmem:[%s1872_s8 + $0x48] sm:$0xff]  ;;  %v398_v53 = vld [vmem:[%s1872_s8 + $0x40] sm:$0xff] }
  0xb0   : > { %748 = vmatpush1.msra.mxu1 %v472_v34  ;;  %660 = vmatprep.subr.mxu0 %v407_v35  ;;  %v464_v50 = vld [vmem:[%s1872_s8 + $0x250] sm:$0xff]  ;;  %v463_v52 = vld [vmem:[%s1872_s8 + $0x248] sm:$0xff]  ;;  %v462_v54 = vld [vmem:[%s1872_s8 + $0x240] sm:$0xff] }
  0xb1   : > { %749 = vmatprep.subr.mxu1 %v471_v36  ;;  %661 = vmatpush1.msra.mxu0 %v406_v37  ;;  %v397_v55 = vld [vmem:[%s1872_s8 + $0x38] sm:$0xff]  ;;  %v396_v57 = vld [vmem:[%s1872_s8 + $0x30] sm:$0xff]  ;;  %v395_v59 = vld [vmem:[%s1872_s8 + $0x28] sm:$0xff] }
  0xb2   : > { %750 = vmatpush1.msra.mxu1 %v470_v38  ;;  %662 = vmatprep.subr.mxu0 %v405_v39  ;;  %v461_v56 = vld [vmem:[%s1872_s8 + $0x238] sm:$0xff]  ;;  %v460_v58 = vld [vmem:[%s1872_s8 + $0x230] sm:$0xff]  ;;  %v459_v60 = vld [vmem:[%s1872_s8 + $0x228] sm:$0xff] }
  0xb3   : > { %751 = vmatprep.subr.mxu1 %v469_v40  ;;  %663 = vmatpush1.msra.mxu0 %v404_v41  ;;  %v394_v61 = vld [vmem:[%s1872_s8 + $0x20] sm:$0xff]  ;;  %v393_v63 = vld [vmem:[%s1872_s8 + $0x18] sm:$0xff]  ;;  %v392_v1 = vld [vmem:[%s1872_s8 + $0x10] sm:$0xff] }
  0xb4   : > { %752 = vmatpush1.msra.mxu1 %v468_v42  ;;  %664 = vmatprep.subr.mxu0 %v403_v43  ;;  %v458_v62 = vld [vmem:[%s1872_s8 + $0x220] sm:$0xff]  ;;  %v457_v0 = vld [vmem:[%s1872_s8 + $0x218] sm:$0xff]  ;;  %v456_v2 = vld [vmem:[%s1872_s8 + $0x210] sm:$0xff] }
  0xb5   : > { %753 = vmatprep.subr.mxu1 %v467_v44  ;;  %665 = vmatpush1.msra.mxu0 %v402_v45  ;;  %v391_v3 = vld [vmem:[%s1872_s8 + $0x8] sm:$0xff]  ;;  %v390_v5 = vld [vmem:[%s1872_s8] sm:$0xff]  ;;  %v453_v7 = vld [vmem:[%s1872_s8 + $0x1f8] sm:$0xff] }
  0xb6   : > { %754 = vmatpush1.msra.mxu1 %v466_v46  ;;  %666 = vmatprep.subr.mxu0 %v401_v47  ;;  %v455_v4 = vld [vmem:[%s1872_s8 + $0x208] sm:$0xff]  ;;  %v454_v6 = vld [vmem:[%s1872_s8 + $0x200] sm:$0xff]  ;;  %v517_v8 = vld [vmem:[%s1872_s8 + $0x3f8] sm:$0xff] }
  0xb7   : > { %755 = vmatprep.subr.mxu1 %v465_v48  ;;  %667 = vmatpush1.msra.mxu0 %v400_v49  ;;  %v452_v9 = vld [vmem:[%s1872_s8 + $0x1f0] sm:$0xff]  ;;  %v451_v11 = vld [vmem:[%s1872_s8 + $0x1e8] sm:$0xff]  ;;  %v450_v13 = vld [vmem:[%s1872_s8 + $0x1e0] sm:$0xff] }
  0xb8   : > { %756 = vmatpush1.msra.mxu1 %v464_v50  ;;  %668 = vmatprep.subr.mxu0 %v399_v51  ;;  %v516_v10 = vld [vmem:[%s1872_s8 + $0x3f0] sm:$0xff]  ;;  %v515_v12 = vld [vmem:[%s1872_s8 + $0x3e8] sm:$0xff]  ;;  %v514_v14 = vld [vmem:[%s1872_s8 + $0x3e0] sm:$0xff] }
  0xb9   : > { %757 = vmatprep.subr.mxu1 %v463_v52  ;;  %669 = vmatpush1.msra.mxu0 %v398_v53  ;;  %v449_v15 = vld [vmem:[%s1872_s8 + $0x1d8] sm:$0xff]  ;;  %v448_v17 = vld [vmem:[%s1872_s8 + $0x1d0] sm:$0xff]  ;;  %v447_v19 = vld [vmem:[%s1872_s8 + $0x1c8] sm:$0xff] }
  0xba   : > { %758 = vmatpush1.msra.mxu1 %v462_v54  ;;  %670 = vmatprep.subr.mxu0 %v397_v55  ;;  %v513_v16 = vld [vmem:[%s1872_s8 + $0x3d8] sm:$0xff]  ;;  %v512_v18 = vld [vmem:[%s1872_s8 + $0x3d0] sm:$0xff]  ;;  %v511_v20 = vld [vmem:[%s1872_s8 + $0x3c8] sm:$0xff] }
  0xbb   : > { %759 = vmatprep.subr.mxu1 %v461_v56  ;;  %671 = vmatpush1.msra.mxu0 %v396_v57  ;;  %v446_v21 = vld [vmem:[%s1872_s8 + $0x1c0] sm:$0xff]  ;;  %v445_v23 = vld [vmem:[%s1872_s8 + $0x1b8] sm:$0xff]  ;;  %v444_v25 = vld [vmem:[%s1872_s8 + $0x1b0] sm:$0xff] }
  0xbc   : > { %760 = vmatpush1.msra.mxu1 %v460_v58  ;;  %672 = vmatprep.subr.mxu0 %v395_v59  ;;  %v510_v22 = vld [vmem:[%s1872_s8 + $0x3c0] sm:$0xff]  ;;  %v509_v24 = vld [vmem:[%s1872_s8 + $0x3b8] sm:$0xff]  ;;  %v508_v26 = vld [vmem:[%s1872_s8 + $0x3b0] sm:$0xff] }
  0xbd   : > { %761 = vmatprep.subr.mxu1 %v459_v60  ;;  %673 = vmatpush1.msra.mxu0 %v394_v61  ;;  %v443_v27 = vld [vmem:[%s1872_s8 + $0x1a8] sm:$0xff]  ;;  %v442_v29 = vld [vmem:[%s1872_s8 + $0x1a0] sm:$0xff]  ;;  %v441_v31 = vld [vmem:[%s1872_s8 + $0x198] sm:$0xff] }
  0xbe   : > { %762 = vmatpush1.msra.mxu1 %v458_v62  ;;  %674 = vmatprep.subr.mxu0 %v393_v63  ;;  %v507_v28 = vld [vmem:[%s1872_s8 + $0x3a8] sm:$0xff]  ;;  %v506_v30 = vld [vmem:[%s1872_s8 + $0x3a0] sm:$0xff]  ;;  %v505_v32 = vld [vmem:[%s1872_s8 + $0x398] sm:$0xff] }
  0xbf   : > { %763 = vmatprep.subr.mxu1 %v457_v0  ;;  %675 = vmatpush1.msra.mxu0 %v392_v1  ;;  %v440_v33 = vld [vmem:[%s1872_s8 + $0x190] sm:$0xff]  ;;  %v439_v35 = vld [vmem:[%s1872_s8 + $0x188] sm:$0xff]  ;;  %v438_v37 = vld [vmem:[%s1872_s8 + $0x180] sm:$0xff] }
  0xc0   : > { %764 = vmatpush1.msra.mxu1 %v456_v2  ;;  %676 = vmatprep.subr.mxu0 %v391_v3  ;;  %v504_v34 = vld [vmem:[%s1872_s8 + $0x390] sm:$0xff]  ;;  %v503_v36 = vld [vmem:[%s1872_s8 + $0x388] sm:$0xff]  ;;  %v502_v38 = vld [vmem:[%s1872_s8 + $0x380] sm:$0xff] }
  0xc1   : > { %765 = vmatprep.subr.mxu1 %v455_v4  ;;  %677 = vmatpush1.msra.mxu0 %v390_v5  ;;  %v437_v39 = vld [vmem:[%s1872_s8 + $0x178] sm:$0xff]  ;;  %v436_v41 = vld [vmem:[%s1872_s8 + $0x170] sm:$0xff]  ;;  %v435_v43 = vld [vmem:[%s1872_s8 + $0x168] sm:$0xff] }
  0xc2   : > { %766 = vmatpush1.msra.mxu1 %v454_v6  ;;  %678 = vmatprep.subr.mxu0 %v453_v7  ;;  %v501_v40 = vld [vmem:[%s1872_s8 + $0x378] sm:$0xff]  ;;  %v500_v42 = vld [vmem:[%s1872_s8 + $0x370] sm:$0xff]  ;;  %v499_v44 = vld [vmem:[%s1872_s8 + $0x368] sm:$0xff] }
  0xc3   : > { %767 = vmatprep.subr.mxu1 %v517_v8  ;;  %679 = vmatpush2.msra.mxu0 %v452_v9  ;;  %v434_v45 = vld [vmem:[%s1872_s8 + $0x160] sm:$0xff]  ;;  %v433_v47 = vld [vmem:[%s1872_s8 + $0x158] sm:$0xff]  ;;  %v432_v49 = vld [vmem:[%s1872_s8 + $0x150] sm:$0xff] }
  0xc4   : > { %768 = vmatpush2.msra.mxu1 %v516_v10  ;;  %680 = vmatprep.subr.mxu0 %v451_v11  ;;  %v498_v46 = vld [vmem:[%s1872_s8 + $0x360] sm:$0xff]  ;;  %v497_v48 = vld [vmem:[%s1872_s8 + $0x358] sm:$0xff]  ;;  %v496_v50 = vld [vmem:[%s1872_s8 + $0x350] sm:$0xff] }
  0xc5   : > { %769 = vmatprep.subr.mxu1 %v515_v12  ;;  %681 = vmatpush2.msra.mxu0 %v450_v13  ;;  %v431_v51 = vld [vmem:[%s1872_s8 + $0x148] sm:$0xff]  ;;  %v430_v53 = vld [vmem:[%s1872_s8 + $0x140] sm:$0xff]  ;;  %v429_v55 = vld [vmem:[%s1872_s8 + $0x138] sm:$0xff] }
  0xc6   : > { %770 = vmatpush2.msra.mxu1 %v514_v14  ;;  %682 = vmatprep.subr.mxu0 %v449_v15  ;;  %v495_v52 = vld [vmem:[%s1872_s8 + $0x348] sm:$0xff]  ;;  %v494_v54 = vld [vmem:[%s1872_s8 + $0x340] sm:$0xff]  ;;  %v493_v56 = vld [vmem:[%s1872_s8 + $0x338] sm:$0xff] }
  0xc7   : > { %771 = vmatprep.subr.mxu1 %v513_v16  ;;  %683 = vmatpush2.msra.mxu0 %v448_v17  ;;  %v428_v57 = vld [vmem:[%s1872_s8 + $0x130] sm:$0xff]  ;;  %v427_v59 = vld [vmem:[%s1872_s8 + $0x128] sm:$0xff]  ;;  %v426_v61 = vld [vmem:[%s1872_s8 + $0x120] sm:$0xff] }
  0xc8   : > { %772 = vmatpush2.msra.mxu1 %v512_v18  ;;  %684 = vmatprep.subr.mxu0 %v447_v19  ;;  %v492_v58 = vld [vmem:[%s1872_s8 + $0x330] sm:$0xff]  ;;  %v491_v60 = vld [vmem:[%s1872_s8 + $0x328] sm:$0xff]  ;;  %v490_v62 = vld [vmem:[%s1872_s8 + $0x320] sm:$0xff] }
  0xc9   : > { %773 = vmatprep.subr.mxu1 %v511_v20  ;;  %685 = vmatpush2.msra.mxu0 %v446_v21  ;;  %v425_v63 = vld [vmem:[%s1872_s8 + $0x118] sm:$0xff]  ;;  %v424_v1 = vld [vmem:[%s1872_s8 + $0x110] sm:$0xff]  ;;  %v423_v3 = vld [vmem:[%s1872_s8 + $0x108] sm:$0xff] }
  0xca   : > { %774 = vmatpush2.msra.mxu1 %v510_v22  ;;  %686 = vmatprep.subr.mxu0 %v445_v23  ;;  %v489_v0 = vld [vmem:[%s1872_s8 + $0x318] sm:$0xff]  ;;  %v488_v2 = vld [vmem:[%s1872_s8 + $0x310] sm:$0xff]  ;;  %v487_v4 = vld [vmem:[%s1872_s8 + $0x308] sm:$0xff] }
  0xcb   : > { %775 = vmatprep.subr.mxu1 %v509_v24  ;;  %687 = vmatpush2.msra.mxu0 %v444_v25  ;;  %v422_v5 = vld [vmem:[%s1872_s8 + $0x100] sm:$0xff]  ;;  %v359_v6 = vld [vmem:[%s1864_s15 + $0x8] sm:$0xff]  ;;  %v361_v8 = vld [vmem:[%s1864_s15 + $0x18] sm:$0xff] }
  0xcc   : > { %776 = vmatpush2.msra.mxu1 %v508_v26  ;;  %688 = vmatprep.subr.mxu0 %v443_v27  ;;  %v486_v7 = vld [vmem:[%s1872_s8 + $0x300] sm:$0xff]  ;;  %v360_v10 = vld [vmem:[%s1864_s15 + $0x10] sm:$0xff]  ;;  %v549_v11 = vld [vmem:[%s1872_s8 + $0x4f8] sm:$0xff] }
  0xcd   : > { %777 = vmatprep.subr.mxu1 %v507_v28  ;;  %689 = vmatpush2.msra.mxu0 %v442_v29  ;;  %v358_v9 = vld [vmem:[%s1864_s15] sm:$0xff]  ;;  %v613_v12 = vld [vmem:[%s1872_s8 + $0x6f8] sm:$0xff]  ;;  %v548_v13 = vld [vmem:[%s1872_s8 + $0x4f0] sm:$0xff] }
  0xce   : > { %778 = vmatpush2.msra.mxu1 %v506_v30  ;;  %690 = vmatprep.subr.mxu0 %v441_v31  ;;  %v612_v14 = vld [vmem:[%s1872_s8 + $0x6f0] sm:$0xff]  ;;  %v547_v15 = vld [vmem:[%s1872_s8 + $0x4e8] sm:$0xff]  ;;  %v546_v17 = vld [vmem:[%s1872_s8 + $0x4e0] sm:$0xff] }
  0xcf   : > { %779 = vmatprep.subr.mxu1 %v505_v32  ;;  %691 = vmatpush2.msra.mxu0 %v440_v33  ;;  %v611_v16 = vld [vmem:[%s1872_s8 + $0x6e8] sm:$0xff]  ;;  %v610_v18 = vld [vmem:[%s1872_s8 + $0x6e0] sm:$0xff]  ;;  %v545_v19 = vld [vmem:[%s1872_s8 + $0x4d8] sm:$0xff] }
  0xd0   : > { %780 = vmatpush2.msra.mxu1 %v504_v34  ;;  %692 = vmatprep.subr.mxu0 %v439_v35  ;;  %v609_v20 = vld [vmem:[%s1872_s8 + $0x6d8] sm:$0xff]  ;;  %v544_v21 = vld [vmem:[%s1872_s8 + $0x4d0] sm:$0xff]  ;;  %v543_v23 = vld [vmem:[%s1872_s8 + $0x4c8] sm:$0xff] }
  0xd1   : > { %781 = vmatprep.subr.mxu1 %v503_v36  ;;  %693 = vmatpush2.msra.mxu0 %v438_v37  ;;  %v608_v22 = vld [vmem:[%s1872_s8 + $0x6d0] sm:$0xff]  ;;  %v607_v24 = vld [vmem:[%s1872_s8 + $0x6c8] sm:$0xff]  ;;  %v542_v25 = vld [vmem:[%s1872_s8 + $0x4c0] sm:$0xff] }
  0xd2   : > { %782 = vmatpush2.msra.mxu1 %v502_v38  ;;  %694 = vmatprep.subr.mxu0 %v437_v39  ;;  %v606_v26 = vld [vmem:[%s1872_s8 + $0x6c0] sm:$0xff]  ;;  %v541_v27 = vld [vmem:[%s1872_s8 + $0x4b8] sm:$0xff]  ;;  %v540_v29 = vld [vmem:[%s1872_s8 + $0x4b0] sm:$0xff] }
  0xd3   : > { %783 = vmatprep.subr.mxu1 %v501_v40  ;;  %695 = vmatpush2.msra.mxu0 %v436_v41  ;;  %v605_v28 = vld [vmem:[%s1872_s8 + $0x6b8] sm:$0xff]  ;;  %v604_v30 = vld [vmem:[%s1872_s8 + $0x6b0] sm:$0xff]  ;;  %v539_v31 = vld [vmem:[%s1872_s8 + $0x4a8] sm:$0xff] }
  0xd4   : > { %784 = vmatpush2.msra.mxu1 %v500_v42  ;;  %696 = vmatprep.subr.mxu0 %v435_v43  ;;  %v603_v32 = vld [vmem:[%s1872_s8 + $0x6a8] sm:$0xff]  ;;  %v538_v33 = vld [vmem:[%s1872_s8 + $0x4a0] sm:$0xff]  ;;  %v537_v35 = vld [vmem:[%s1872_s8 + $0x498] sm:$0xff] }
  0xd5   : > { %785 = vmatprep.subr.mxu1 %v499_v44  ;;  %697 = vmatpush2.msra.mxu0 %v434_v45  ;;  %v602_v34 = vld [vmem:[%s1872_s8 + $0x6a0] sm:$0xff]  ;;  %v601_v36 = vld [vmem:[%s1872_s8 + $0x698] sm:$0xff]  ;;  %v536_v37 = vld [vmem:[%s1872_s8 + $0x490] sm:$0xff] }
  0xd6   : > { %786 = vmatpush2.msra.mxu1 %v498_v46  ;;  %698 = vmatprep.subr.mxu0 %v433_v47  ;;  %v600_v38 = vld [vmem:[%s1872_s8 + $0x690] sm:$0xff]  ;;  %v535_v39 = vld [vmem:[%s1872_s8 + $0x488] sm:$0xff]  ;;  %v534_v41 = vld [vmem:[%s1872_s8 + $0x480] sm:$0xff] }
  0xd7   : > { %787 = vmatprep.subr.mxu1 %v497_v48  ;;  %699 = vmatpush2.msra.mxu0 %v432_v49  ;;  %v599_v40 = vld [vmem:[%s1872_s8 + $0x688] sm:$0xff]  ;;  %v598_v42 = vld [vmem:[%s1872_s8 + $0x680] sm:$0xff]  ;;  %v533_v43 = vld [vmem:[%s1872_s8 + $0x478] sm:$0xff] }
  0xd8   : > { %788 = vmatpush2.msra.mxu1 %v496_v50  ;;  %700 = vmatprep.subr.mxu0 %v431_v51  ;;  %v597_v44 = vld [vmem:[%s1872_s8 + $0x678] sm:$0xff]  ;;  %v532_v45 = vld [vmem:[%s1872_s8 + $0x470] sm:$0xff]  ;;  %v531_v47 = vld [vmem:[%s1872_s8 + $0x468] sm:$0xff] }
  0xd9   : > { %789 = vmatprep.subr.mxu1 %v495_v52  ;;  %701 = vmatpush2.msra.mxu0 %v430_v53  ;;  %v596_v46 = vld [vmem:[%s1872_s8 + $0x670] sm:$0xff]  ;;  %v595_v48 = vld [vmem:[%s1872_s8 + $0x668] sm:$0xff]  ;;  %v530_v49 = vld [vmem:[%s1872_s8 + $0x460] sm:$0xff] }
  0xda   : > { %790 = vmatpush2.msra.mxu1 %v494_v54  ;;  %702 = vmatprep.subr.mxu0 %v429_v55  ;;  %v594_v50 = vld [vmem:[%s1872_s8 + $0x660] sm:$0xff]  ;;  %v529_v51 = vld [vmem:[%s1872_s8 + $0x458] sm:$0xff]  ;;  %v528_v53 = vld [vmem:[%s1872_s8 + $0x450] sm:$0xff] }
  0xdb   : > { %791 = vmatprep.subr.mxu1 %v493_v56  ;;  %703 = vmatpush2.msra.mxu0 %v428_v57  ;;  %v593_v52 = vld [vmem:[%s1872_s8 + $0x658] sm:$0xff]  ;;  %v592_v54 = vld [vmem:[%s1872_s8 + $0x650] sm:$0xff]  ;;  %v527_v55 = vld [vmem:[%s1872_s8 + $0x448] sm:$0xff] }
  0xdc   : > { %792 = vmatpush2.msra.mxu1 %v492_v58  ;;  %704 = vmatprep.subr.mxu0 %v427_v59  ;;  %v591_v56 = vld [vmem:[%s1872_s8 + $0x648] sm:$0xff]  ;;  %v526_v57 = vld [vmem:[%s1872_s8 + $0x440] sm:$0xff]  ;;  %v525_v59 = vld [vmem:[%s1872_s8 + $0x438] sm:$0xff] }
  0xdd   : > { %793 = vmatprep.subr.mxu1 %v491_v60  ;;  %705 = vmatpush2.msra.mxu0 %v426_v61  ;;  %v590_v58 = vld [vmem:[%s1872_s8 + $0x640] sm:$0xff]  ;;  %v589_v60 = vld [vmem:[%s1872_s8 + $0x638] sm:$0xff]  ;;  %v524_v61 = vld [vmem:[%s1872_s8 + $0x430] sm:$0xff] }
  0xde   : > { %794 = vmatpush2.msra.mxu1 %v490_v62  ;;  %706 = vmatprep.subr.mxu0 %v425_v63  ;;  %v588_v62 = vld [vmem:[%s1872_s8 + $0x630] sm:$0xff]  ;;  %v523_v63 = vld [vmem:[%s1872_s8 + $0x428] sm:$0xff] }
  0xdf   : > { %795 = vmatprep.subr.mxu1 %v489_v0  ;;  %707 = vmatpush2.msra.mxu0 %v424_v1  ;;  %v587_v0 = vld [vmem:[%s1872_s8 + $0x628] sm:$0xff]  ;;  %v522_v1 = vld [vmem:[%s1872_s8 + $0x420] sm:$0xff] }
  0xe0   : > { %796 = vmatpush2.msra.mxu1 %v488_v2  ;;  %708 = vmatprep.subr.mxu0 %v423_v3  ;;  %v586_v2 = vld [vmem:[%s1872_s8 + $0x620] sm:$0xff]  ;;  %v521_v3 = vld [vmem:[%s1872_s8 + $0x418] sm:$0xff] }
  0xe1   : > { %797 = vmatprep.subr.mxu1 %v487_v4  ;;  %709 = vmatpush2.msra.mxu0 %v422_v5  ;;  %v585_v4 = vld [vmem:[%s1872_s8 + $0x618] sm:$0xff]  ;;  %v520_v5 = vld [vmem:[%s1872_s8 + $0x410] sm:$0xff] }
  0xe2   : > { %710 = vmatprep.mubr.f32.mxu0 %v359_v6  ;;  %798 = vmatpush2.msra.mxu1 %v486_v7  ;;  %v584_v6 = vld [vmem:[%s1872_s8 + $0x610] sm:$0xff]  ;;  %v519_v7 = vld [vmem:[%s1872_s8 + $0x408] sm:$0xff] }
  0xe3   : > { %799 = vmatprep.mubr.f32.mxu1 %v361_v8  ;;  %711 = vmatmul.mubr.f32.vlgmr.msra.gmra.mxu0 %v358_v9  ;;  %v583_v8 = vld [vmem:[%s1872_s8 + $0x608] sm:$0xff]  ;;  %v518_v9 = vld [vmem:[%s1872_s8 + $0x400] sm:$0xff] }
  0xe4   : > { %800 = vmatmul.mubr.f32.vlgmr.msra.gmra.mxu1 %v360_v10  ;;  %824 = vmatprep.subr.mxu0 %v549_v11  ;;  %v582_v10 = vld [vmem:[%s1872_s8 + $0x600] sm:$0xff]  ;;  %v581_v11 = vld [vmem:[%s1872_s8 + $0x5f8] sm:$0xff] }
  0xe5   : > { %913 = vmatprep.subr.mxu1 %v613_v12  ;;  %825 = vmatpush1.msra.mxu0 %v548_v13  ;;  %v645_v12 = vld [vmem:[%s1872_s8 + $0x7f8] sm:$0xff]  ;;  %v580_v13 = vld [vmem:[%s1872_s8 + $0x5f0] sm:$0xff] }
  0xe6   : > { %914 = vmatpush1.msra.mxu1 %v612_v14  ;;  %826 = vmatprep.subr.mxu0 %v547_v15  ;;  %v644_v14 = vld [vmem:[%s1872_s8 + $0x7f0] sm:$0xff]  ;;  %v579_v15 = vld [vmem:[%s1872_s8 + $0x5e8] sm:$0xff] }
  0xe7   : > { %915 = vmatprep.subr.mxu1 %v611_v16  ;;  %827 = vmatpush1.msra.mxu0 %v546_v17  ;;  %v643_v16 = vld [vmem:[%s1872_s8 + $0x7e8] sm:$0xff]  ;;  %v578_v17 = vld [vmem:[%s1872_s8 + $0x5e0] sm:$0xff] }
  0xe8   : > { %916 = vmatpush1.msra.mxu1 %v610_v18  ;;  %828 = vmatprep.subr.mxu0 %v545_v19  ;;  %v642_v18 = vld [vmem:[%s1872_s8 + $0x7e0] sm:$0xff]  ;;  %v577_v19 = vld [vmem:[%s1872_s8 + $0x5d8] sm:$0xff] }
  0xe9   : > { %917 = vmatprep.subr.mxu1 %v609_v20  ;;  %829 = vmatpush1.msra.mxu0 %v544_v21  ;;  %v641_v20 = vld [vmem:[%s1872_s8 + $0x7d8] sm:$0xff]  ;;  %v576_v21 = vld [vmem:[%s1872_s8 + $0x5d0] sm:$0xff] }
  0xea   : > { %918 = vmatpush1.msra.mxu1 %v608_v22  ;;  %830 = vmatprep.subr.mxu0 %v543_v23  ;;  %v640_v22 = vld [vmem:[%s1872_s8 + $0x7d0] sm:$0xff]  ;;  %v575_v23 = vld [vmem:[%s1872_s8 + $0x5c8] sm:$0xff] }
  0xeb   : > { %919 = vmatprep.subr.mxu1 %v607_v24  ;;  %831 = vmatpush1.msra.mxu0 %v542_v25  ;;  %v639_v24 = vld [vmem:[%s1872_s8 + $0x7c8] sm:$0xff]  ;;  %v574_v25 = vld [vmem:[%s1872_s8 + $0x5c0] sm:$0xff] }
  0xec   : > { %920 = vmatpush1.msra.mxu1 %v606_v26  ;;  %832 = vmatprep.subr.mxu0 %v541_v27  ;;  %v638_v26 = vld [vmem:[%s1872_s8 + $0x7c0] sm:$0xff]  ;;  %v573_v27 = vld [vmem:[%s1872_s8 + $0x5b8] sm:$0xff] }
  0xed   : > { %921 = vmatprep.subr.mxu1 %v605_v28  ;;  %833 = vmatpush1.msra.mxu0 %v540_v29  ;;  %v637_v28 = vld [vmem:[%s1872_s8 + $0x7b8] sm:$0xff]  ;;  %v572_v29 = vld [vmem:[%s1872_s8 + $0x5b0] sm:$0xff] }
  0xee   : > { %922 = vmatpush1.msra.mxu1 %v604_v30  ;;  %834 = vmatprep.subr.mxu0 %v539_v31  ;;  %v636_v30 = vld [vmem:[%s1872_s8 + $0x7b0] sm:$0xff]  ;;  %v571_v31 = vld [vmem:[%s1872_s8 + $0x5a8] sm:$0xff] }
  0xef   : > { %923 = vmatprep.subr.mxu1 %v603_v32  ;;  %835 = vmatpush1.msra.mxu0 %v538_v33  ;;  %v635_v32 = vld [vmem:[%s1872_s8 + $0x7a8] sm:$0xff]  ;;  %v570_v33 = vld [vmem:[%s1872_s8 + $0x5a0] sm:$0xff] }
  0xf0   : > { %924 = vmatpush1.msra.mxu1 %v602_v34  ;;  %836 = vmatprep.subr.mxu0 %v537_v35  ;;  %v634_v34 = vld [vmem:[%s1872_s8 + $0x7a0] sm:$0xff]  ;;  %v569_v35 = vld [vmem:[%s1872_s8 + $0x598] sm:$0xff] }
  0xf1   : > { %925 = vmatprep.subr.mxu1 %v601_v36  ;;  %837 = vmatpush1.msra.mxu0 %v536_v37  ;;  %v633_v36 = vld [vmem:[%s1872_s8 + $0x798] sm:$0xff]  ;;  %v568_v37 = vld [vmem:[%s1872_s8 + $0x590] sm:$0xff] }
  0xf2   : > { %926 = vmatpush1.msra.mxu1 %v600_v38  ;;  %838 = vmatprep.subr.mxu0 %v535_v39  ;;  %v632_v38 = vld [vmem:[%s1872_s8 + $0x790] sm:$0xff]  ;;  %v567_v39 = vld [vmem:[%s1872_s8 + $0x588] sm:$0xff] }
  0xf3   : > { %927 = vmatprep.subr.mxu1 %v599_v40  ;;  %839 = vmatpush1.msra.mxu0 %v534_v41  ;;  %v631_v40 = vld [vmem:[%s1872_s8 + $0x788] sm:$0xff]  ;;  %v566_v41 = vld [vmem:[%s1872_s8 + $0x580] sm:$0xff] }
  0xf4   : > { %928 = vmatpush1.msra.mxu1 %v598_v42  ;;  %840 = vmatprep.subr.mxu0 %v533_v43  ;;  %v630_v42 = vld [vmem:[%s1872_s8 + $0x780] sm:$0xff]  ;;  %v565_v43 = vld [vmem:[%s1872_s8 + $0x578] sm:$0xff] }
  0xf5   : > { %929 = vmatprep.subr.mxu1 %v597_v44  ;;  %841 = vmatpush1.msra.mxu0 %v532_v45  ;;  %v629_v44 = vld [vmem:[%s1872_s8 + $0x778] sm:$0xff]  ;;  %v367_v45 = vld [vmem:[%s1864_s15 + $0x48] sm:$0xff] }
  0xf6   : > { %930 = vmatpush1.msra.mxu1 %v596_v46  ;;  %842 = vmatprep.subr.mxu0 %v531_v47  ;;  %v369_v46 = vld [vmem:[%s1864_s15 + $0x58] sm:$0xff]  ;;  %v564_v47 = vld [vmem:[%s1872_s8 + $0x570] sm:$0xff] }
  0xf7   : > { %931 = vmatprep.subr.mxu1 %v595_v48  ;;  %843 = vmatpush1.msra.mxu0 %v530_v49  ;;  %v628_v48 = vld [vmem:[%s1872_s8 + $0x770] sm:$0xff]  ;;  %v366_v49 = vld [vmem:[%s1864_s15 + $0x40] sm:$0xff] }
  0xf8   : > { %932 = vmatpush1.msra.mxu1 %v594_v50  ;;  %844 = vmatprep.subr.mxu0 %v529_v51  ;;  %v368_v50 = vld [vmem:[%s1864_s15 + $0x50] sm:$0xff]  ;;  %v563_v51 = vld [vmem:[%s1872_s8 + $0x568] sm:$0xff] }
  0xf9   : > { %933 = vmatprep.subr.mxu1 %v593_v52  ;;  %845 = vmatpush1.msra.mxu0 %v528_v53  ;;  %v627_v52 = vld [vmem:[%s1872_s8 + $0x768] sm:$0xff]  ;;  %v562_v53 = vld [vmem:[%s1872_s8 + $0x560] sm:$0xff] }
  0xfa   : > { %934 = vmatpush1.msra.mxu1 %v592_v54  ;;  %846 = vmatprep.subr.mxu0 %v527_v55  ;;  %v626_v54 = vld [vmem:[%s1872_s8 + $0x760] sm:$0xff]  ;;  %v561_v55 = vld [vmem:[%s1872_s8 + $0x558] sm:$0xff] }
  0xfb   : > { %935 = vmatprep.subr.mxu1 %v591_v56  ;;  %847 = vmatpush1.msra.mxu0 %v526_v57  ;;  %v625_v56 = vld [vmem:[%s1872_s8 + $0x758] sm:$0xff]  ;;  %v375_v57 = vld [vmem:[%s1864_s15 + $0x88] sm:$0xff] }
  0xfc   : > { %936 = vmatpush1.msra.mxu1 %v590_v58  ;;  %848 = vmatprep.subr.mxu0 %v525_v59  ;;  %v377_v58 = vld [vmem:[%s1864_s15 + $0x98] sm:$0xff]  ;;  %v560_v59 = vld [vmem:[%s1872_s8 + $0x550] sm:$0xff] }
  0xfd   : > { %937 = vmatprep.subr.mxu1 %v589_v60  ;;  %849 = vmatpush1.msra.mxu0 %v524_v61  ;;  %v624_v60 = vld [vmem:[%s1872_s8 + $0x750] sm:$0xff]  ;;  %v374_v61 = vld [vmem:[%s1864_s15 + $0x80] sm:$0xff] }
  0xfe   : > { %938 = vmatpush1.msra.mxu1 %v588_v62  ;;  %850 = vmatprep.subr.mxu0 %v523_v63  ;;  %v376_v62 = vld [vmem:[%s1864_s15 + $0x90] sm:$0xff]  ;;  %v559_v63 = vld [vmem:[%s1872_s8 + $0x548] sm:$0xff] }
  0xff   : > { %939 = vmatprep.subr.mxu1 %v587_v0  ;;  %851 = vmatpush1.msra.mxu0 %v522_v1  ;;  %v623_v0 = vld [vmem:[%s1872_s8 + $0x748] sm:$0xff]  ;;  %v558_v1 = vld [vmem:[%s1872_s8 + $0x540] sm:$0xff] }
 0x100   : > { %940 = vmatpush1.msra.mxu1 %v586_v2  ;;  %852 = vmatprep.subr.mxu0 %v521_v3  ;;  %v622_v2 = vld [vmem:[%s1872_s8 + $0x740] sm:$0xff]  ;;  %v557_v3 = vld [vmem:[%s1872_s8 + $0x538] sm:$0xff] }
 0x101   : > { %941 = vmatprep.subr.mxu1 %v585_v4  ;;  %853 = vmatpush1.msra.mxu0 %v520_v5  ;;  %v621_v4 = vld [vmem:[%s1872_s8 + $0x738] sm:$0xff]  ;;  %v383_v5 = vld [vmem:[%s1864_s15 + $0xc8] sm:$0xff] }
 0x102   : > { %942 = vmatpush1.msra.mxu1 %v584_v6  ;;  %854 = vmatprep.subr.mxu0 %v519_v7  ;;  %v385_v6 = vld [vmem:[%s1864_s15 + $0xd8] sm:$0xff]  ;;  %v556_v7 = vld [vmem:[%s1872_s8 + $0x530] sm:$0xff] }
 0x103   : > { %943 = vmatprep.subr.mxu1 %v583_v8  ;;  %855 = vmatpush1.msra.mxu0 %v518_v9  ;;  %v620_v8 = vld [vmem:[%s1872_s8 + $0x730] sm:$0xff]  ;;  %v382_v9 = vld [vmem:[%s1864_s15 + $0xc0] sm:$0xff] }
 0x104   : > { %944 = vmatpush1.msra.mxu1 %v582_v10  ;;  %856 = vmatprep.subr.mxu0 %v581_v11  ;;  %v384_v10 = vld [vmem:[%s1864_s15 + $0xd0] sm:$0xff]  ;;  %v555_v11 = vld [vmem:[%s1872_s8 + $0x528] sm:$0xff] }
 0x105   : > { %945 = vmatprep.subr.mxu1 %v645_v12  ;;  %857 = vmatpush2.msra.mxu0 %v580_v13  ;;  %v619_v12 = vld [vmem:[%s1872_s8 + $0x728] sm:$0xff]  ;;  %v554_v13 = vld [vmem:[%s1872_s8 + $0x520] sm:$0xff] }
 0x106   : > { %946 = vmatpush2.msra.mxu1 %v644_v14  ;;  %858 = vmatprep.subr.mxu0 %v579_v15  ;;  %v618_v14 = vld [vmem:[%s1872_s8 + $0x720] sm:$0xff]  ;;  %v553_v15 = vld [vmem:[%s1872_s8 + $0x518] sm:$0xff] }
 0x107   : > { %947 = vmatprep.subr.mxu1 %v643_v16  ;;  %859 = vmatpush2.msra.mxu0 %v578_v17  ;;  %v617_v16 = vld [vmem:[%s1872_s8 + $0x718] sm:$0xff]  ;;  %v552_v17 = vld [vmem:[%s1872_s8 + $0x510] sm:$0xff] }
 0x108   : > { %948 = vmatpush2.msra.mxu1 %v642_v18  ;;  %860 = vmatprep.subr.mxu0 %v577_v19  ;;  %v616_v18 = vld [vmem:[%s1872_s8 + $0x710] sm:$0xff]  ;;  %v551_v19 = vld [vmem:[%s1872_s8 + $0x508] sm:$0xff] }
 0x109   : > { %949 = vmatprep.subr.mxu1 %v641_v20  ;;  %861 = vmatpush2.msra.mxu0 %v576_v21  ;;  %v615_v20 = vld [vmem:[%s1872_s8 + $0x708] sm:$0xff]  ;;  %v550_v21 = vld [vmem:[%s1872_s8 + $0x500] sm:$0xff] }
 0x10a   : > { %950 = vmatpush2.msra.mxu1 %v640_v22  ;;  %862 = vmatprep.subr.mxu0 %v575_v23  ;;  %v363_v22 = vld [vmem:[%s1864_s15 + $0x28] sm:$0xff]  ;;  %v614_v23 = vld [vmem:[%s1872_s8 + $0x700] sm:$0xff] }
 0x10b   : > { %951 = vmatprep.subr.mxu1 %v639_v24  ;;  %863 = vmatpush2.msra.mxu0 %v574_v25  ;;  %v365_v24 = vld [vmem:[%s1864_s15 + $0x38] sm:$0xff]  ;;  %v362_v25 = vld [vmem:[%s1864_s15 + $0x20] sm:$0xff] }
 0x10c   : > { %952 = vmatpush2.msra.mxu1 %v638_v26  ;;  %864 = vmatprep.subr.mxu0 %v573_v27  ;;  %v364_v26 = vld [vmem:[%s1864_s15 + $0x30] sm:$0xff]  ;;  %v371_v27 = vld [vmem:[%s1864_s15 + $0x68] sm:$0xff] }
 0x10d   : > { %953 = vmatprep.subr.mxu1 %v637_v28  ;;  %865 = vmatpush2.msra.mxu0 %v572_v29  ;;  %v373_v28 = vld [vmem:[%s1864_s15 + $0x78] sm:$0xff]  ;;  %v370_v29 = vld [vmem:[%s1864_s15 + $0x60] sm:$0xff] }
 0x10e   : > { %954 = vmatpush2.msra.mxu1 %v636_v30  ;;  %866 = vmatprep.subr.mxu0 %v571_v31  ;;  %v372_v30 = vld [vmem:[%s1864_s15 + $0x70] sm:$0xff]  ;;  %v379_v31 = vld [vmem:[%s1864_s15 + $0xa8] sm:$0xff] }
 0x10f   : > { %955 = vmatprep.subr.mxu1 %v635_v32  ;;  %867 = vmatpush2.msra.mxu0 %v570_v33  ;;  %v381_v32 = vld [vmem:[%s1864_s15 + $0xb8] sm:$0xff]  ;;  %v378_v33 = vld [vmem:[%s1864_s15 + $0xa0] sm:$0xff] }
 0x110   : > { %956 = vmatpush2.msra.mxu1 %v634_v34  ;;  %868 = vmatprep.subr.mxu0 %v569_v35  ;;  %v380_v34 = vld [vmem:[%s1864_s15 + $0xb0] sm:$0xff]  ;;  %v387_v35 = vld [vmem:[%s1864_s15 + $0xe8] sm:$0xff] }
 0x111   : > { %957 = vmatprep.subr.mxu1 %v633_v36  ;;  %869 = vmatpush2.msra.mxu0 %v568_v37  ;;  %v389_v36 = vld [vmem:[%s1864_s15 + $0xf8] sm:$0xff]  ;;  %v386_v37 = vld [vmem:[%s1864_s15 + $0xe0] sm:$0xff] }
 0x112   : > { %958 = vmatpush2.msra.mxu1 %v632_v38  ;;  %870 = vmatprep.subr.mxu0 %v567_v39  ;;  %v388_v38 = vld [vmem:[%s1864_s15 + $0xf0] sm:$0xff] }
 0x113   : > { %959 = vmatprep.subr.mxu1 %v631_v40  ;;  %871 = vmatpush2.msra.mxu0 %v566_v41 }
 0x114   : > { %960 = vmatpush2.msra.mxu1 %v630_v42  ;;  %872 = vmatprep.subr.mxu0 %v565_v43 }
 0x115   : > { %961 = vmatprep.subr.mxu1 %v629_v44  ;;  %716 = vmatprep.mubr.f32.mxu0 %v367_v45 }
 0x116   : > { %805 = vmatprep.mubr.f32.mxu1 %v369_v46  ;;  %873 = vmatpush2.msra.mxu0 %v564_v47 }
 0x117   : > { %962 = vmatpush2.msra.mxu1 %v628_v48  ;;  %717 = vmatmul.mubr.f32.gmra.mxu0 %v366_v49 }
 0x118   : > { %806 = vmatmul.mubr.f32.gmra.mxu1 %v368_v50  ;;  %874 = vmatprep.subr.mxu0 %v563_v51 }
 0x119   : > { %963 = vmatprep.subr.mxu1 %v627_v52  ;;  %875 = vmatpush2.msra.mxu0 %v562_v53 }
 0x11a   : > { %964 = vmatpush2.msra.mxu1 %v626_v54  ;;  %876 = vmatprep.subr.mxu0 %v561_v55 }
 0x11b   : > { %965 = vmatprep.subr.mxu1 %v625_v56  ;;  %722 = vmatprep.mubr.f32.mxu0 %v375_v57 }
 0x11c   : > { %811 = vmatprep.mubr.f32.mxu1 %v377_v58  ;;  %877 = vmatpush2.msra.mxu0 %v560_v59 }
 0x11d   : > { %966 = vmatpush2.msra.mxu1 %v624_v60  ;;  %723 = vmatmul.mubr.f32.gmra.mxu0 %v374_v61  ;;  %v350_v60 = vld [vmem:[#allocation2 + $0x30] sm:$0xff] }
 0x11e   : > { %812 = vmatmul.mubr.f32.gmra.mxu1 %v376_v62  ;;  %878 = vmatprep.subr.mxu0 %v559_v63 }
 0x11f   : > { %967 = vmatprep.subr.mxu1 %v623_v0  ;;  %879 = vmatpush2.msra.mxu0 %v558_v1 }
 0x120   : > { %968 = vmatpush2.msra.mxu1 %v622_v2  ;;  %880 = vmatprep.subr.mxu0 %v557_v3  ;;  %v351_v2 = vld [vmem:[#allocation2] sm:$0xff] }
 0x121   : > { %969 = vmatprep.subr.mxu1 %v621_v4  ;;  %728 = vmatprep.mubr.f32.mxu0 %v383_v5 }
 0x122   : > { %817 = vmatprep.mubr.f32.mxu1 %v385_v6  ;;  %881 = vmatpush2.msra.mxu0 %v556_v7 }
 0x123   : > { %970 = vmatpush2.msra.mxu1 %v620_v8  ;;  %729 = vmatmul.mubr.f32.gmra.mxu0 %v382_v9  ;;  %v352_v9 = vld [vmem:[#allocation2 + $0x18] sm:$0xff] }
 0x124   : > { %818 = vmatmul.mubr.f32.gmra.mxu1 %v384_v10  ;;  %882 = vmatprep.subr.mxu0 %v555_v11 }
 0x125   : > { %971 = vmatprep.subr.mxu1 %v619_v12  ;;  %883 = vmatpush2.msra.mxu0 %v554_v13 }
 0x126   : > { %972 = vmatpush2.msra.mxu1 %v618_v14  ;;  %884 = vmatprep.subr.mxu0 %v553_v15 }
 0x127   : > { %973 = vmatprep.subr.mxu1 %v617_v16  ;;  %885 = vmatpush2.msra.mxu0 %v552_v17  ;;  %v353_v16 = vld [vmem:[#allocation2 + $0x10] sm:$0xff] }
 0x128   : > { %974 = vmatpush2.msra.mxu1 %v616_v18  ;;  %886 = vmatprep.subr.mxu0 %v551_v19 }
 0x129   : > { %975 = vmatprep.subr.mxu1 %v615_v20  ;;  %887 = vmatpush2.msra.mxu0 %v550_v21 }
 0x12a   : > { %888 = vmatprep.mubr.f32.mxu0 %v363_v22  ;;  %976 = vmatpush2.msra.mxu1 %v614_v23  ;;  %v354_v23 = vld [vmem:[#allocation2 + $0x8] sm:$0xff] }
 0x12b   : > { %977 = vmatprep.mubr.f32.mxu1 %v365_v24  ;;  %889 = vmatmul.mubr.f32.vlgmr.msra.gmra.mxu0 %v362_v25 }
 0x12c   : > { %978 = vmatmul.mubr.f32.vlgmr.msra.gmra.mxu1 %v364_v26  ;;  %894 = vmatprep.mubr.f32.mxu0 %v371_v27 }
 0x12d   : > { %983 = vmatprep.mubr.f32.mxu1 %v373_v28 }
 0x12f   : > { %895 = vmatmul.mubr.f32.gmra.mxu0 %v370_v29 }
 0x130   : > { %984 = vmatmul.mubr.f32.gmra.mxu1 %v372_v30  ;;  %900 = vmatprep.mubr.f32.mxu0 %v379_v31  ;;  %v355_v30 = vld [vmem:[#allocation2 + $0x20] sm:$0xff] }
 0x131   : > { %989 = vmatprep.mubr.f32.mxu1 %v381_v32 }
 0x133   : > { %901 = vmatmul.mubr.f32.gmra.mxu0 %v378_v33 }
 0x134   : > { %990 = vmatmul.mubr.f32.gmra.mxu1 %v380_v34  ;;  %906 = vmatprep.mubr.f32.mxu0 %v387_v35 }
 0x135   : > { %995 = vmatprep.mubr.f32.mxu1 %v389_v36 }
 0x137   : > { %907 = vmatmul.mubr.f32.gmra.mxu0 %v386_v37  ;;  %v356_v37 = vld [vmem:[#allocation2 + $0x28] sm:$0xff] }
 0x138   : > { %996 = vmatmul.mubr.f32.gmra.mxu1 %v388_v38 }
 0x1a3   : > { %v712_v39 = vpop.f32.mrf.mxu0 }
 0x1a4   : > { %v801_v40 = vpop.f32.mrf.mxu1 }
 0x1a5   : > { %v714_v41 = vpop.f32.mrf.mxu0  ;;  %v802_v55 = vadd.f32 %v801_v40, %v712_v39 }
 0x1a6   : > { %v803_v42 = vpop.f32.mrf.mxu1 }
 0x1a7   : > { %v804_v58 = vadd.f32 %v803_v42, %v714_v41  ;;  %v357_v42 = vld [vmem:[#allocation2 + $0x38] sm:$0xff] }
 0x1d7   : > { %v718_v43 = vpop.f32.mrf.mxu0 }
 0x1d8   : > { %v807_v44 = vpop.f32.mrf.mxu1 }
 0x1d9   : > { %v720_v45 = vpop.f32.mrf.mxu0  ;;  %v808_v63 = vadd.f32 %v807_v44, %v718_v43 }
 0x1da   : > { %v809_v46 = vpop.f32.mrf.mxu1 }
 0x1db   : > { %v810_v5 = vadd.f32 %v809_v46, %v720_v45 }
 0x1dd   : > { %v724_v47 = vpop.f32.mrf.mxu0 }
 0x1de   : > { %v813_v48 = vpop.f32.mrf.mxu1 }
 0x1df   : > { %v726_v49 = vpop.f32.mrf.mxu0  ;;  %v814_v12 = vadd.f32 %v813_v48, %v724_v47 }
 0x1e0   : > { %v815_v50 = vpop.f32.mrf.mxu1 }
 0x1e1   : > { %v816_v19 = vadd.f32 %v815_v50, %v726_v49 }
 0x1e3   : > { %v730_v51 = vpop.f32.mrf.mxu0 }
 0x1e4   : > { %v819_v52 = vpop.f32.mrf.mxu1 }
 0x1e5   : > { %v732_v53 = vpop.f32.mrf.mxu0  ;;  %v820_v26 = vadd.f32 %v819_v52, %v730_v51 }
 0x1e6   : > { %v821_v54 = vpop.f32.mrf.mxu1 }
 0x1e7   : > { %v822_v33 = vadd.f32 %v821_v54, %v732_v53 }
 0x1eb   : > { %v890_v56 = vpop.f32.mrf.mxu0 }
 0x1ec   : > { %v979_v57 = vpop.f32.mrf.mxu1  ;;  %v891_v59 = vadd.f32 %v890_v56, %v802_v55 }
 0x1ed   : > { %v892_v61 = vpop.f32.mrf.mxu0 }
 0x1ee   : > { %v981_v62 = vpop.f32.mrf.mxu1  ;;  %v980_v0 = vadd.f32 %v979_v57, %v891_v59  ;;  %v893_v1 = vadd.f32 %v892_v61, %v804_v58 }
 0x1ef   : > { %v896_v3 = vpop.f32.mrf.mxu0 }
 0x1f0   : > { %v985_v4 = vpop.f32.mrf.mxu1  ;;  %v1002_v6 = vadd.f32 %v980_v0, %v350_v60  ;;  %v982_v7 = vadd.f32 %v981_v62, %v893_v1  ;;  %v897_v8 = vadd.f32 %v896_v3, %v808_v63 }
 0x1f1   : > { %v898_v10 = vpop.f32.mrf.mxu0 }
 0x1f2   : > { %v987_v11 = vpop.f32.mrf.mxu1  ;;  %1010 = vst [vmem:[#allocation2 + $0x30] sm:$0xff] %v1002_v6  ;;  %v1003_v13 = vadd.f32 %v982_v7, %v351_v2  ;;  %v986_v14 = vadd.f32 %v985_v4, %v897_v8  ;;  %v899_v15 = vadd.f32 %v898_v10, %v810_v5 }
 0x1f3   : > { %v902_v17 = vpop.f32.mrf.mxu0 }
 0x1f4   : > { %v991_v18 = vpop.f32.mrf.mxu1  ;;  %1011 = vst [vmem:[#allocation2] sm:$0xff] %v1003_v13  ;;  %v1004_v20 = vadd.f32 %v986_v14, %v352_v9  ;;  %v988_v21 = vadd.f32 %v987_v11, %v899_v15  ;;  %v903_v22 = vadd.f32 %v902_v17, %v814_v12 }
 0x1f5   : > { %v904_v24 = vpop.f32.mrf.mxu0 }
 0x1f6   : > { %v993_v25 = vpop.f32.mrf.mxu1  ;;  %1012 = vst [vmem:[#allocation2 + $0x18] sm:$0xff] %v1004_v20  ;;  %v1005_v27 = vadd.f32 %v988_v21, %v353_v16  ;;  %v992_v28 = vadd.f32 %v991_v18, %v903_v22  ;;  %v905_v29 = vadd.f32 %v904_v24, %v816_v19 }
 0x1f7   : > { %v908_v31 = vpop.f32.mrf.mxu0 }
 0x1f8   : > { %v997_v32 = vpop.f32.mrf.mxu1  ;;  %1013 = vst [vmem:[#allocation2 + $0x10] sm:$0xff] %v1005_v27  ;;  %v1006_v34 = vadd.f32 %v992_v28, %v354_v23  ;;  %v994_v35 = vadd.f32 %v993_v25, %v905_v29  ;;  %v909_v36 = vadd.f32 %v908_v31, %v820_v26 }
 0x1f9   : > { %v910_v38 = vpop.f32.mrf.mxu0 }
 0x1fa   : > { %1014 = vst [vmem:[#allocation2 + $0x8] sm:$0xff] %v1006_v34  ;;  %v1007_v39 = vadd.f32 %v994_v35, %v355_v30  ;;  %v998_v40 = vadd.f32 %v997_v32, %v909_v36  ;;  %v911_v41 = vadd.f32 %v910_v38, %v822_v33  ;;  %v999_v43 = vpop.f32.mrf.mxu1 }
 0x1fc   : > { %1015 = vst [vmem:[#allocation2 + $0x20] sm:$0xff] %v1007_v39  ;;  %v1008_v44 = vadd.f32 %v998_v40, %v356_v37  ;;  %v1000_v45 = vadd.f32 %v999_v43, %v911_v41  ;;  %1021 = sbr.rel (%p1229_p0) target bundleno = 521 (0x209), region = 52 }
 0x1fe   : > { %1016 = vst [vmem:[#allocation2 + $0x28] sm:$0xff] %v1008_v44  ;;  %v1009_v46 = vadd.f32 %v1000_v45, %v357_v42 }
 0x200   : > { %1017 = vst [vmem:[#allocation2 + $0x38] sm:$0xff] %v1009_v46 }
 0x201   : > { %v1022_v47 = vld [vmem:[#allocation2 + $0x30] sm:$0xff]  ;;  %v1023_v48 = vld [vmem:[#allocation2] sm:$0xff]  ;;  %v1024_v49 = vld [vmem:[#allocation2 + $0x18] sm:$0xff] }
 0x202   : > { %1030 = vst [vmem:[%s1887_s21] sm:$0xff] %v1022_v47  ;;  %1031 = vst [vmem:[%s1887_s21 + $0x8] sm:$0xff] %v1023_v48  ;;  %v1025_v50 = vld [vmem:[#allocation2 + $0x10] sm:$0xff]  ;;  %v1026_v51 = vld [vmem:[#allocation2 + $0x8] sm:$0xff] }
 0x203   : > { %1032 = vst [vmem:[%s1887_s21 + $0x10] sm:$0xff] %v1024_v49  ;;  %v1027_v52 = vld [vmem:[#allocation2 + $0x20] sm:$0xff]  ;;  %1033 = vst [vmem:[%s1887_s21 + $0x18] sm:$0xff] %v1025_v50 }
 0x204   : > { %1034 = vst [vmem:[%s1887_s21 + $0x20] sm:$0xff] %v1026_v51  ;;  %1035 = vst [vmem:[%s1887_s21 + $0x28] sm:$0xff] %v1027_v52 }
 0x205   : > { %v1028_v53 = vld [vmem:[#allocation2 + $0x28] sm:$0xff] }
 0x206   : > { %1036 = vst [vmem:[%s1887_s21 + $0x30] sm:$0xff] %v1028_v53 }
 0x207   : > { %v1029_v54 = vld [vmem:[#allocation2 + $0x38] sm:$0xff] }
 0x208   : > { %1037 = vst [vmem:[%s1887_s21 + $0x38] sm:$0xff] %v1029_v54 }
 0x209 PF: > { %s1039_s22 = scalar_lea.sflag [#allocation5], %s1879_s27  ;;  %s2330_s18 = sld [smem:[#allocation24_spill]] }
 0x20f   : > { %p2331_p10 = scmp.ne.s32.totalorder %s2330_s18, 0 }
 0x210   : > { %s2332_s0 = sld [smem:[#allocation17_spill]] (%p2331_p10) }
 0x211   : > { %1045 = sbr.rel (!%p2331_p10) target bundleno = 566 (0x236), region = 56 }
 0x216   : > { %s1231_s20 = sshll.u32 %s2332_s0, 1 }
 0x217   : > { %s1048_s6 = ssub.s32 3, %s1231_s20 }
 0x218   : > { %p1049_p11 = scmp.lt.s32.totalorder %s1048_s6, 2 }
 0x21a   : > { %s2367_s6 = smov (!%p1049_p11, %s1048_s6), 2 }
 0x21b   : > { %s2194_s12 = sshll.u32 %s2367_s6, 9 }
 0x21c   : > { %s1053_s10 = ssub.s32 1024, %s2194_s12 }
 0x21d   : > { %1054 = vsyncadd %s1039_s22, %s1053_s10  ;;  %p1233_p4 = scmp.ne.s32.totalorder %s2194_s12, 0  ;;  %s1244_s15 = sshll.u32 %s2332_s0, 8 }
 0x21e   : > { %s2333_s3 = sld [smem:[#allocation27_spill]]  ;;  %s1235_s8 = sshll.u32 %s2367_s6, 3 }
 0x21f   : > { %s1062_s29 = sshll.u32 %s1887_s21, 4  ;;  %s1617_s5 = smov [#allocation9]   ;;  %s2208_s29 = int_to_ptr.vmem [resolvable:$true] %s1062_s29 }
 0x220   : > { %s1455_s7 = scalar_lea.vmem %s2208_s29, %s2194_s12  ;;  %s1459_s26 = sshll.u32 %s1617_s5, 4  ;;  %s1460_s26 = int_to_ptr.vmem [resolvable:$false] %s1459_s26 }
 0x221   : > { %p1456_p6 = scmp.ne.s32.totalorder %s2208_s29, %s1455_s7  ;;  %s1461_s9 = scalar_lea.vmem %s1460_s26, 2048 }
 0x222   : > { %p1462_p7 = scmp.lt.s32.totalorder %s2208_s29, %s1460_s26  ;;  %p1463_p3 = scmp.lt.s32.totalorder %s1461_s9, %s1455_s7 }
 0x223   : > { %p1457_p9 = pnand %p1456_p6, %p1233_p4 }
 0x224   : > { %s2204_s4 = scalar_lea.hbm %s2333_s3, %s1244_s15  ;;  %p1464_p13 = por %p1463_p3, %p1462_p7 }
 0x225   : > { %p1458_p2 = pneg %p1457_p9 }
 0x227   : > { %p1465_p12 = pnand %p1464_p13, %p1458_p2 }
 0x229   : > { %1468 = shalt.err (!%p1465_p12)
}
 0x22a   : > { %s1469_s21 = scalar_lea.hbm %s2204_s4, %s2194_s12  ;;  %s1473_s0 = scalar_lea.hbm %s2333_s3, 1536 }
 0x22b   : > { %p1470_p1 = scmp.ne.s32.totalorder %s2204_s4, %s1469_s21  ;;  %p1474_p0 = scmp.lt.s32.totalorder %s2204_s4, %s2333_s3 }
 0x22c   : > { %p1475_p10 = scmp.lt.s32.totalorder %s1473_s0, %s1469_s21 }
 0x22d   : > { %p1471_p5 = pnand %p1470_p1, %p1233_p4 }
 0x22e   : > { %p1476_p11 = por %p1475_p10, %p1474_p0 }
 0x22f   : > { %p1472_p8 = pneg %p1471_p5 }
 0x231   : > { %p1477_p6 = pnand %p1476_p11, %p1472_p8 }
 0x233   : > { %1480 = shalt.err (!%p1477_p6)
}
 0x234   : > { %s1618_s15 = smov 256   ;;  %s1619_s28 = smov 384  }
 0x235   : > { %1068 = dma.vmem_to_hbm [thread:$0]  (%p1233_p4), %s2208_s29, %s2194_s12, %s2204_s4, %s1039_s22, %s1618_s15, %s1619_s28, %s1235_s8  }
 0x236 PF: > { %s2334_s11 = sld [smem:[#allocation14_spill]]  ;;  %p1257_p9 = scmp.ge.s32.totalorder %s1607_s25, 2 }
 0x237   : > { %s2335_s7 = sld [smem:[#allocation25_spill]] }
 0x23c   : > { %s1077_s5 = sand.u32 1, %s2334_s11  }
 0x23d   : > { %p2336_p2 = scmp.ne.s32.totalorder %s2335_s7, 0  ;;  %s1078_s26 = scalar_lea.sflag [#allocation5], %s1077_s5 }
 0x23f   : > { %p1254_p7 = pnand %p1257_p9, %p2336_p2 }
 0x241   : > { %p1255_p3 = pneg %p1254_p7 }
 0x243   : > { %1550 = dma.done.wait (%p1255_p3), %s1078_s26, 1024  }
 0x244   : > { %1552 = vsyncadd (%p1255_p3), %s1078_s26, 4294966272  ;;  %s22_s25 = sadd.s32 1, %s1607_s25   ;;  %s2338_s27 = sld [smem:[#allocation22_spill]] }
 0x245   : > { %p2242_p13 = scmp.ge.s32.totalorder %s22_s25, 6   ;;  %s2339_s22 = sld [smem:[#allocation21_spill]] }
 0x246   : > { %s2340_s6 = sld [smem:[#allocation15_spill]]  ;;  %s2344_s12 = smov %s1559_s13 }
 0x247   : > { %s2341_s20 = sld [smem:[#allocation20_spill]]  ;;  %s2345_s13 = smov %s1563_s14 }
 0x248   : > { %s2342_s4 = sld [smem:[#allocation18_spill]]  ;;  %s2347_s15 = smov %s1571_s16 }
 0x249   : > { %s2343_s8 = sld [smem:[#allocation19_spill]]  ;;  %s2348_s16 = smov %s1575_s17 }
 0x24a   : > { %s2346_s14 = smov %s2338_s27  ;;  %s2350_s18 = smov %s1583_s19 }
 0x24b   : > { %s2349_s17 = smov %s2339_s22  ;;  %s2352_s21 = smov %s1599_s23 }
 0x24c   : > { %s2351_s19 = smov %s2340_s6  ;;  %s2353_s22 = smov %s1603_s24 }
 0x24d   :  { %21 = sbr.rel (!%p2242_p13) target bundleno = 15 (0xf), region = 109 }
 0x24e   : > { %s2354_s23 = smov %s2342_s4 }
 0x24f   : > { %s2355_s24 = smov %s2343_s8 }
 0x252   :  { %1083 = vsyncpa [#allocation4], 1 }
 0x253   :  { %1085 = vsyncpa [#allocation4 + $0x1], 1 }
 0x254   :  { %1086 = vsyncpa [#allocation7], 1 }
 0x255   :  { %1088 = vsyncpa [#allocation7 + $0x1], 1 }
 0x256   :  { %1089 = vsyncpa [#allocation5], 1 }
 0x257   :  { %1091 = vsyncpa [#allocation5 + $0x1], 1 }

</bundles_post_ra>
